<compile_context>
chip_gen: v5e
topology: v5e:2x2
jax: 0.10.0
libtpu: 0.0.40
codegen_flags: <defaults>
</compile_context>

<pallas_src>
import functools

import numpy as np

import jax
import jax.numpy as jnp
from jax.experimental import pallas as pl
from jax.experimental.pallas import tpu as pltpu


# ----------------------------------------------------------------------------
# One-time weight preprocessing: conv layer -> dense unfolded operator
# ----------------------------------------------------------------------------
def _unfold_conv_layer(w_oihw, cin, H, W, k, stride, pad):
    """Build T with flat_nchw(conv(x)) = flat_nchw(x) @ T (zero padding folded in)."""
    cout = w_oihw.shape[0]
    OH = (H + 2 * pad - k) // stride + 1
    OW = (W + 2 * pad - k) // stride + 1

    co, ci, ki, kj, oh, ow = np.meshgrid(
        np.arange(cout), np.arange(cin), np.arange(k), np.arange(k),
        np.arange(OH), np.arange(OW), indexing="ij")
    h = stride * oh + ki - pad
    w = stride * ow + kj - pad
    valid = (h >= 0) & (h < H) & (w >= 0) & (w < W)     # out-of-range == zero pad
    co, ci, ki, kj, oh, ow, h, w = (a[valid] for a in (co, ci, ki, kj, oh, ow, h, w))

    rows = (ci * H + h) * W + w            # NCHW flat index into the layer input
    cols = (co * OH + oh) * OW + ow        # NCHW flat index into the layer output
    vals = w_oihw[co, ci, ki, kj].astype(jnp.float32)

    T = jnp.zeros((cin * H * W, cout * OH * OW), jnp.float32).at[rows, cols].set(vals)
    return T, OH, OW


def unfold_encoder_params(params, layer_specs, in_channels, H, W):
    """One-time setup (outside jit): per-layer (T, bias_row) + final (C, OH, OW)."""
    mats = []
    cin, h, w = in_channels, H, W
    for (wgt, b), (cout, k, s, p) in zip(params, layer_specs):
        T, oh, ow = _unfold_conv_layer(wgt, cin, h, w, k, s, p)
        b_row = jnp.repeat(b.astype(jnp.float32), oh * ow).reshape(1, cout * oh * ow)
        mats.append((T, b_row))
        cin, h, w = cout, oh, ow
    return mats, (cin, h, w)


# ----------------------------------------------------------------------------
# Fused Pallas kernel: per image, chain of (flat @ T_l + b_l -> ReLU)
# ----------------------------------------------------------------------------
def _make_fused_encoder_kernel(num_layers):
    def kernel(x_ref, *refs):
        # x_ref : (1, 1, C0*H0*W0)   one flattened NCHW image
        # refs  : (T_1, b_1, ..., T_L, b_L, out)
        o_ref = refs[-1]
        h = x_ref[0]                                          # (1, K0)
        for l in range(num_layers):
            t_ref = refs[2 * l]
            b_ref = refs[2 * l + 1]
            h = jnp.dot(h, t_ref[...], preferred_element_type=jnp.float32)
            h = jnp.maximum(h + b_ref[...], 0.0)              # bias + ReLU, stays in VMEM
        o_ref[0] = h.astype(o_ref.dtype)
    return kernel


@functools.partial(jax.jit, static_argnames=("out_chw",))
def encoder_forward(x_nchw, mats, out_chw):
    """x_nchw: (N, C, H, W) f32; mats: list of (T_l, b_row_l); returns NCHW output."""
    N, C, H, W = x_nchw.shape
    K0 = C * H * W
    F_out = mats[-1][0].shape[1]

    # NCHW flattening matches the operator layout -> free reshape, no transpose.
    x_flat = x_nchw.astype(jnp.float32).reshape(N, 1, K0)

    in_specs = [pl.BlockSpec((1, 1, K0), lambda n: (n, 0, 0))]
    operands = [x_flat]
    for T, b_row in mats:
        kl, fl = T.shape
        # Whole operator / bias resident in VMEM (constant block index across grid).
        in_specs.append(pl.BlockSpec((kl, fl), lambda n: (0, 0)))
        in_specs.append(pl.BlockSpec((1, fl), lambda n: (0, 0)))
        operands += [T, b_row]

    out = pl.pallas_call(
        _make_fused_encoder_kernel(len(mats)),
        out_shape=jax.ShapeDtypeStruct((N, 1, F_out), jnp.float32),
        grid_spec=pltpu.PrefetchScalarGridSpec(
            num_scalar_prefetch=0,
            grid=(N,),                                     # one image per grid step
            in_specs=in_specs,
            out_specs=pl.BlockSpec((1, 1, F_out), lambda n: (n, 0, 0)),
        ),
        compiler_params=pltpu.CompilerParams(
            dimension_semantics=("parallel",),             # batch across TCs on v7x
            vmem_limit_bytes=32 * 1024 * 1024,
        ),
    )(*operands)

    return out.reshape((N,) + out_chw)                     # contiguous -> free reshape


# ----------------------------------------------------------------------------
# Parameter init (PyTorch Conv2d style, OIHW layout) + pure-JAX reference
# ----------------------------------------------------------------------------
def init_encoder_params(key, in_channels, layer_specs):
    params = []
    cin = in_channels
    for (cout, k, _s, _p) in layer_specs:
        key, kw_, kb_ = jax.random.split(key, 3)
        fan_in = cin * k * k
        bound = 1.0 / (fan_in ** 0.5)
        w = jax.random.uniform(kw_, (cout, cin, k, k), jnp.float32, -bound, bound)
        b = jax.random.uniform(kb_, (cout,), jnp.float32, -bound, bound)
        params.append((w, b))
        cin = cout
    return params


def _reference_encoder(x, params, layer_specs):
    out = x
    for (w, b), (_cout, _k, s, p) in zip(params, layer_specs):
        out = jax.lax.conv_general_dilated(
            out, w, window_strides=(s, s), padding=((p, p), (p, p)),
            dimension_numbers=("NCHW", "OIHW", "NCHW"),
            precision=jax.lax.Precision.HIGHEST)
        out = jnp.maximum(out + b.reshape(1, -1, 1, 1), 0.0)
    return out


if __name__ == "__main__":
    key = jax.random.PRNGKey(0)
    k_x, k_p = jax.random.split(key)

    # Encoder(in_channels=4, layers=[(8, 3, 2, 1), (16, 3, 2, 1)])
    in_channels = 4
    layer_specs = [(8, 3, 2, 1), (16, 3, 2, 1)]   # (cout, kernel, stride, pad)
    N, H, W = 2, 16, 16

    x = jax.random.normal(k_x, (N, in_channels, H, W), dtype=jnp.float32)  # NCHW
    params = init_encoder_params(k_p, in_channels, layer_specs)

    # One-time setup: strides/pads are folded into dense operators here, so the
    # jitted forward never traces python ints (fixes the previous crash).
    mats, out_chw = unfold_encoder_params(params, layer_specs, in_channels, H, W)

    y = encoder_forward(x, mats, out_chw)
    jax.block_until_ready(y)

    assert y.shape == (N, 16, 4, 4), y.shape      # 16x16 -> 8x8 -> 4x4, Cout=16

    y_ref = _reference_encoder(x, params, layer_specs)
    max_err = float(jnp.max(jnp.abs(y - y_ref)))
    assert jnp.allclose(y, y_ref, rtol=2e-2, atol=2e-2), max_err

    print("KERNEL_OK")
</pallas_src>

<mosaic_0001>
module attributes {stable_mosaic.version = 11 : i64} {
  func.func @kernel(%arg0: i32, %arg1: memref<1x1x1024xf32, #tpu.memory_space<vmem>>, %arg2: memref<1024x512xf32, #tpu.memory_space<vmem>>, %arg3: memref<1x512xf32, #tpu.memory_space<vmem>>, %arg4: memref<512x256xf32, #tpu.memory_space<vmem>>, %arg5: memref<1x256xf32, #tpu.memory_space<vmem>>, %arg6: memref<1x1x256xf32, #tpu.memory_space<vmem>>) attributes {dimension_semantics = [#tpu.dimension_semantics<parallel>], iteration_bounds = array<i64: 2>, scalar_prefetch = 0 : i64, scratch_operands = 0 : i64, tpu.core_type = #tpu.core_type<tc>, window_params = [{transform_indices = @transform_0, window_bounds = array<i64: 1, 1, 1024>}, {pipeline_mode = #tpu.pipeline_mode<synchronous>, transform_indices = @transform_1, window_bounds = array<i64: 1024, 512>}, {pipeline_mode = #tpu.pipeline_mode<synchronous>, transform_indices = @transform_2, window_bounds = array<i64: 1, 512>}, {pipeline_mode = #tpu.pipeline_mode<synchronous>, transform_indices = @transform_3, window_bounds = array<i64: 512, 256>}, {pipeline_mode = #tpu.pipeline_mode<synchronous>, transform_indices = @transform_4, window_bounds = array<i64: 1, 256>}, {transform_indices = @transform_5, window_bounds = array<i64: 1, 1, 256>}]} {
    %c0 = arith.constant 0 : index
    %c0_0 = arith.constant 0 : index
    %c0_1 = arith.constant 0 : index
    %0 = vector.load %arg1[%c0, %c0_0, %c0_1] : memref<1x1x1024xf32, #tpu.memory_space<vmem>>, vector<1x1x1024xf32>
    %1 = vector.shape_cast %0 : vector<1x1x1024xf32> to vector<1x1024xf32>
    %c0_2 = arith.constant 0 : index
    %c0_3 = arith.constant 0 : index
    %2 = vector.load %arg2[%c0_2, %c0_3] : memref<1024x512xf32, #tpu.memory_space<vmem>>, vector<1024x512xf32>
    %cst = arith.constant dense<0.000000e+00> : vector<1x512xf32>
    %3 = tpu.matmul %1, %2, %cst {dimension_numbers = #tpu.dot_dimension_numbers<[1], [0], [0], [1], [0, 0, 1, 1], [], []>} : vector<1x1024xf32>, vector<1024x512xf32>, vector<1x512xf32> -> vector<1x512xf32>
    %c0_4 = arith.constant 0 : index
    %c0_5 = arith.constant 0 : index
    %4 = vector.load %arg3[%c0_4, %c0_5] : memref<1x512xf32, #tpu.memory_space<vmem>>, vector<1x512xf32>
    %5 = arith.addf %3, %4 : vector<1x512xf32>
    %cst_6 = arith.constant 0.000000e+00 : f32
    %6 = vector.broadcast %cst_6 : f32 to vector<1x512xf32>
    %7 = arith.maximumf %5, %6 : vector<1x512xf32>
    %c0_7 = arith.constant 0 : index
    %c0_8 = arith.constant 0 : index
    %8 = vector.load %arg4[%c0_7, %c0_8] : memref<512x256xf32, #tpu.memory_space<vmem>>, vector<512x256xf32>
    %cst_9 = arith.constant dense<0.000000e+00> : vector<1x256xf32>
    %9 = tpu.matmul %7, %8, %cst_9 {dimension_numbers = #tpu.dot_dimension_numbers<[1], [0], [0], [1], [0, 0, 1, 1], [], []>} : vector<1x512xf32>, vector<512x256xf32>, vector<1x256xf32> -> vector<1x256xf32>
    %c0_10 = arith.constant 0 : index
    %c0_11 = arith.constant 0 : index
    %10 = vector.load %arg5[%c0_10, %c0_11] : memref<1x256xf32, #tpu.memory_space<vmem>>, vector<1x256xf32>
    %11 = arith.addf %9, %10 : vector<1x256xf32>
    %cst_12 = arith.constant 0.000000e+00 : f32
    %12 = vector.broadcast %cst_12 : f32 to vector<1x256xf32>
    %13 = arith.maximumf %11, %12 : vector<1x256xf32>
    %c0_13 = arith.constant 0 : index
    %c0_14 = arith.constant 0 : index
    %c0_15 = arith.constant 0 : index
    %14 = vector.load %arg6[%c0_13, %c0_14, %c0_15] : memref<1x1x256xf32, #tpu.memory_space<vmem>>, vector<1x1x256xf32>
    %15 = vector.shape_cast %14 : vector<1x1x256xf32> to vector<1x256xf32>
    %16 = vector.shape_cast %13 : vector<1x256xf32> to vector<1x1x256xf32>
    tpu.vector_store %arg6[%c0_13, %c0_14, %c0_15], %16 {strides = array<i32>} : memref<1x1x256xf32, #tpu.memory_space<vmem>>, vector<1x1x256xf32>,
    return
  }
  func.func @transform_0(%arg0: i32) -> (i32, i32, i32) {
    %c0_i32 = arith.constant 0 : i32
    %c0_i32_0 = arith.constant 0 : i32
    %c0_i32_1 = arith.constant 0 : i32
    return %arg0, %c0_i32, %c0_i32_0 : i32, i32, i32
  }
  func.func @transform_1(%arg0: i32) -> (i32, i32) {
    %c0_i32 = arith.constant 0 : i32
    %c0_i32_0 = arith.constant 0 : i32
    %c0_i32_1 = arith.constant 0 : i32
    return %c0_i32, %c0_i32_0 : i32, i32
  }
  func.func @transform_2(%arg0: i32) -> (i32, i32) {
    %c0_i32 = arith.constant 0 : i32
    %c0_i32_0 = arith.constant 0 : i32
    %c0_i32_1 = arith.constant 0 : i32
    return %c0_i32, %c0_i32_0 : i32, i32
  }
  func.func @transform_3(%arg0: i32) -> (i32, i32) {
    %c0_i32 = arith.constant 0 : i32
    %c0_i32_0 = arith.constant 0 : i32
    %c0_i32_1 = arith.constant 0 : i32
    return %c0_i32, %c0_i32_0 : i32, i32
  }
  func.func @transform_4(%arg0: i32) -> (i32, i32) {
    %c0_i32 = arith.constant 0 : i32
    %c0_i32_0 = arith.constant 0 : i32
    %c0_i32_1 = arith.constant 0 : i32
    return %c0_i32, %c0_i32_0 : i32, i32
  }
  func.func @transform_5(%arg0: i32) -> (i32, i32, i32) {
    %c0_i32 = arith.constant 0 : i32
    %c0_i32_0 = arith.constant 0 : i32
    %c0_i32_1 = arith.constant 0 : i32
    return %arg0, %c0_i32, %c0_i32_0 : i32, i32, i32
  }
}

</mosaic_0001>

<bundles_post_ra>
// kernel: encoder_forward.1
= control target key start
LH: loop header
LB: loop body
LE: loop exit
PB: predicated region body
PF: predicated region fallthrough
CT: control target
= control target key end

     0   :  { %10 = vsyncpa [#allocation3], 0  ;;  %s2292_s0 = inlined_call_operand.vmem [shape: f32[2,1,1024], index: 0, kind: input, shape index: {}]   ;;  %s2293_s1 = inlined_call_operand.hbm [shape: f32[1024,512], index: 1, kind: input, shape index: {}]   ;;  %s2294_s2 = inlined_call_operand.hbm [shape: f32[1,512], index: 2, kind: input, shape index: {}]   ;;  %s2295_s3 = inlined_call_operand.hbm [shape: f32[512,256], index: 3, kind: input, shape index: {}]   ;;  %s2296_s4 = inlined_call_operand.hbm [shape: f32[1,256], index: 4, kind: input, shape index: {}]   ;;  %s2297_s5 = inlined_call_operand.vmem [shape: f32[2,1,256], index: 5, kind: output, shape index: {}]  }
   0x1   :  { %11 = vsyncpa [#allocation5], 0 }
   0x2   :  { %12 = vsyncpa [#allocation8], 0  ;;  %s2116_s18 = smov 0  }
   0x3 LB: > { %s185_s21 = sshll.u32 %s2294_s2, 4  ;;  %s2125_s22 = sadd.s32 4294967295, %s2076_s18   ;;  %s2076_s18 = sphi %s2116_s18, %s18_s18   ;;  %s186_s21 = int_to_ptr.hbm [resolvable:$true] %s185_s21 }
   0x4   : > { %p1870_p0 = scmp.ge.s32.totalorder %s2076_s18, 1  ;;  %p159_p1 = scmp.lt.s32.totalorder %s2076_s18, 3 }
   0x5   : > { %p1914_p2 = scmp.eq.s32.totalorder %s2125_s22, 0  ;;  %s2078_s24 = smov [#allocation4]  }
   0x6   : > { %p2130_p3 = pnand %p1870_p0, %p159_p1  ;;  %s187_s25 = sshll.u32 %s2078_s24, 4  ;;  %s188_s25 = int_to_ptr.vmem [resolvable:$true] %s187_s25 }
   0x7   : > { %s170_s28 = sshll.u32 %s2293_s1, 4  ;;  %s2079_s30 = smov [#allocation2]   ;;  %s171_s28 = int_to_ptr.hbm [resolvable:$true] %s170_s28 }
   0x8   : > { %p1901_p4 = pneg %p2130_p3  ;;  %s172_s6 = sshll.u32 %s2079_s30, 4  ;;  %s173_s6 = int_to_ptr.vmem [resolvable:$true] %s172_s6 }
   0x9   : > { %s196_s9 = sshll.u32 %s2295_s3, 4  ;;  %s2080_s10 = smov 512   ;;  %s197_s9 = int_to_ptr.hbm [resolvable:$true] %s196_s9 }
   0xa   : > { %p2141_p5 = pnand %p1914_p2, %p1901_p4  ;;  %s2081_s11 = smov 32  }
   0xb   : > { %s2082_s12 = smov [#allocation6]   ;;  %s2083_s14 = smov 256  }
   0xc   : > { %1907 = dma.hbm_to_vmem [thread:$0]  (!%p2141_p5), %s186_s21, 64, %s188_s25, [#allocation5]  }
   0xd   : > { %1904 = dma.hbm_to_vmem [thread:$0]  (!%p2141_p5), %s171_s28, 65536, %s173_s6, [#allocation3], %s2080_s10, %s2080_s10, %s2081_s11  }
   0xe   : > { %s198_s13 = sshll.u32 %s2082_s12, 4  ;;  %s2084_s15 = smov 16   ;;  %s199_s13 = int_to_ptr.vmem [resolvable:$true] %s198_s13 }
   0xf   : > { %1910 = dma.hbm_to_vmem [thread:$0]  (!%p2141_p5), %s197_s9, 16384, %s199_s13, [#allocation5], %s2083_s14, %s2083_s14, %s2084_s15  }
  0x10   : > { %s211_s19 = sshll.u32 %s2296_s4, 4  ;;  %s2085_s20 = smov [#allocation7]   ;;  %s212_s19 = int_to_ptr.hbm [resolvable:$true] %s211_s19 }
  0x11   : > { %s213_s21 = sshll.u32 %s2085_s20, 4  ;;  %233 = sbr.rel (%p2130_p3) target bundleno = 681 (0x2a9), region = 40  ;;  %s214_s21 = int_to_ptr.vmem [resolvable:$true] %s213_s21 }
  0x12   : > { %1913 = dma.hbm_to_vmem [thread:$0]  (!%p2141_p5), %s212_s19, 32, %s214_s21, [#allocation8]  }
  0x16   : > { %2063 = dma.done.wait (%p1914_p2), [#allocation3], 65536  }
  0x17   : > { %2065 = vsyncadd (%p1914_p2), [#allocation3], 4294901760 }
  0x18   : > { %2067 = dma.done.wait (%p1914_p2), [#allocation5], 16448  }
  0x19   : > { %2069 = vsyncadd (%p1914_p2), [#allocation5], 4294950848 }
  0x1a   : > { %2071 = dma.done.wait (%p1914_p2), [#allocation8], 32  }
  0x1b   : > { %2073 = vsyncadd (%p1914_p2), [#allocation8], 4294967264  ;;  %v344_v0 = vld [vmem:[#allocation2 + $0x1e0] sm:$0xff]  ;;  %p275_p6 = scmp.lt.s32.totalorder %s2125_s22, 1  ;;  %vm1766_vm0 = vcmask 1040384  }
  0x1c   : > { %v408_v1 = vld [vmem:[#allocation2 + $0x3e0] sm:$0xff]  ;;  %823 = vmatpush.msra.mxu0 %v344_v0 }
  0x1d   : > { %v472_v2 = vld [vmem:[#allocation2 + $0x5e0] sm:$0xff]  ;;  %843 = vmatpush.msra.mxu1 %v408_v1  ;;  %s2301_s22 = smov (!%p275_p6, %s2125_s22), 1 }
  0x1e   : > { %v340_v3 = vld [vmem:[#allocation2 + $0x1c0] sm:$0xff]  ;;  %863 = vmatpush.msra.mxu2 %v472_v2  ;;  %s1881_s23 = sshll.u32 %s2301_s22, 3  ;;  %s1882_s27 = sshll.u32 %s2301_s22, 1 }
  0x1f   : > { %v404_v4 = vld [vmem:[#allocation2 + $0x3c0] sm:$0xff]  ;;  %824 = vmatpush.msra.mxu0 %v340_v3  ;;  %s278_s26 = scalar_lea.vmem %s2292_s0, %s1881_s23  ;;  %s282_s30 = scalar_lea.vmem %s2297_s5, %s1882_s27 }
  0x20   : > { %v468_v5 = vld [vmem:[#allocation2 + $0x5c0] sm:$0xff]  ;;  %844 = vmatpush.msra.mxu1 %v404_v4 }
  0x21   : > { %v536_v6 = vld [vmem:[#allocation2 + $0x7e0] sm:$0xff]  ;;  %864 = vmatpush.msra.mxu2 %v468_v5 }
  0x22   : > { %v336_v7 = vld [vmem:[#allocation2 + $0x1a0] sm:$0xff]  ;;  %883 = vmatpush.msra.mxu3 %v536_v6 }
  0x23   : > { %v400_v8 = vld [vmem:[#allocation2 + $0x3a0] sm:$0xff]  ;;  %825 = vmatpush.msra.mxu0 %v336_v7 }
  0x24   : > { %v464_v9 = vld [vmem:[#allocation2 + $0x5a0] sm:$0xff]  ;;  %845 = vmatpush.msra.mxu1 %v400_v8 }
  0x25   : > { %v532_v10 = vld [vmem:[#allocation2 + $0x7c0] sm:$0xff]  ;;  %865 = vmatpush.msra.mxu2 %v464_v9 }
  0x26   : > { %v332_v11 = vld [vmem:[#allocation2 + $0x180] sm:$0xff]  ;;  %884 = vmatpush.msra.mxu3 %v532_v10 }
  0x27   : > { %v396_v12 = vld [vmem:[#allocation2 + $0x380] sm:$0xff]  ;;  %826 = vmatpush.msra.mxu0 %v332_v11 }
  0x28   : > { %v460_v13 = vld [vmem:[#allocation2 + $0x580] sm:$0xff]  ;;  %846 = vmatpush.msra.mxu1 %v396_v12 }
  0x29   : > { %v528_v14 = vld [vmem:[#allocation2 + $0x7a0] sm:$0xff]  ;;  %866 = vmatpush.msra.mxu2 %v460_v13 }
  0x2a   : > { %v328_v15 = vld [vmem:[#allocation2 + $0x160] sm:$0xff]  ;;  %885 = vmatpush.msra.mxu3 %v528_v14 }
  0x2b   : > { %v392_v16 = vld [vmem:[#allocation2 + $0x360] sm:$0xff]  ;;  %827 = vmatpush.msra.mxu0 %v328_v15 }
  0x2c   : > { %v456_v17 = vld [vmem:[#allocation2 + $0x560] sm:$0xff]  ;;  %847 = vmatpush.msra.mxu1 %v392_v16 }
  0x2d   : > { %v524_v18 = vld [vmem:[#allocation2 + $0x780] sm:$0xff]  ;;  %867 = vmatpush.msra.mxu2 %v456_v17 }
  0x2e   : > { %v324_v19 = vld [vmem:[#allocation2 + $0x140] sm:$0xff]  ;;  %886 = vmatpush.msra.mxu3 %v524_v18 }
  0x2f   : > { %v388_v20 = vld [vmem:[#allocation2 + $0x340] sm:$0xff]  ;;  %828 = vmatpush.msra.mxu0 %v324_v19 }
  0x30   : > { %v452_v21 = vld [vmem:[#allocation2 + $0x540] sm:$0xff]  ;;  %848 = vmatpush.msra.mxu1 %v388_v20 }
  0x31   : > { %v520_v22 = vld [vmem:[#allocation2 + $0x760] sm:$0xff]  ;;  %868 = vmatpush.msra.mxu2 %v452_v21 }
  0x32   : > { %v320_v23 = vld [vmem:[#allocation2 + $0x120] sm:$0xff]  ;;  %887 = vmatpush.msra.mxu3 %v520_v22 }
  0x33   : > { %v384_v24 = vld [vmem:[#allocation2 + $0x320] sm:$0xff]  ;;  %829 = vmatpush.msra.mxu0 %v320_v23 }
  0x34   : > { %v448_v25 = vld [vmem:[#allocation2 + $0x520] sm:$0xff]  ;;  %849 = vmatpush.msra.mxu1 %v384_v24 }
  0x35   : > { %v516_v26 = vld [vmem:[#allocation2 + $0x740] sm:$0xff]  ;;  %869 = vmatpush.msra.mxu2 %v448_v25 }
  0x36   : > { %v316_v27 = vld [vmem:[#allocation2 + $0x100] sm:$0xff]  ;;  %888 = vmatpush.msra.mxu3 %v516_v26 }
  0x37   : > { %v380_v28 = vld [vmem:[#allocation2 + $0x300] sm:$0xff]  ;;  %830 = vmatpush.msra.mxu0 %v316_v27 }
  0x38   : > { %v444_v29 = vld [vmem:[#allocation2 + $0x500] sm:$0xff]  ;;  %850 = vmatpush.msra.mxu1 %v380_v28 }
  0x39   : > { %v512_v30 = vld [vmem:[#allocation2 + $0x720] sm:$0xff]  ;;  %870 = vmatpush.msra.mxu2 %v444_v29 }
  0x3a   : > { %v312_v31 = vld [vmem:[#allocation2 + $0xe0] sm:$0xff]  ;;  %889 = vmatpush.msra.mxu3 %v512_v30 }
  0x3b   : > { %v376_v32 = vld [vmem:[#allocation2 + $0x2e0] sm:$0xff]  ;;  %831 = vmatpush.msra.mxu0 %v312_v31 }
  0x3c   : > { %v440_v33 = vld [vmem:[#allocation2 + $0x4e0] sm:$0xff]  ;;  %851 = vmatpush.msra.mxu1 %v376_v32 }
  0x3d   : > { %v508_v34 = vld [vmem:[#allocation2 + $0x700] sm:$0xff]  ;;  %871 = vmatpush.msra.mxu2 %v440_v33 }
  0x3e   : > { %v308_v35 = vld [vmem:[#allocation2 + $0xc0] sm:$0xff]  ;;  %890 = vmatpush.msra.mxu3 %v508_v34 }
  0x3f   : > { %v372_v36 = vld [vmem:[#allocation2 + $0x2c0] sm:$0xff]  ;;  %832 = vmatpush.msra.mxu0 %v308_v35 }
  0x40   : > { %v436_v37 = vld [vmem:[#allocation2 + $0x4c0] sm:$0xff]  ;;  %852 = vmatpush.msra.mxu1 %v372_v36 }
  0x41   : > { %v504_v38 = vld [vmem:[#allocation2 + $0x6e0] sm:$0xff]  ;;  %872 = vmatpush.msra.mxu2 %v436_v37 }
  0x42   : > { %v304_v39 = vld [vmem:[#allocation2 + $0xa0] sm:$0xff]  ;;  %891 = vmatpush.msra.mxu3 %v504_v38 }
  0x43   : > { %v368_v40 = vld [vmem:[#allocation2 + $0x2a0] sm:$0xff]  ;;  %833 = vmatpush.msra.mxu0 %v304_v39 }
  0x44   : > { %v432_v41 = vld [vmem:[#allocation2 + $0x4a0] sm:$0xff]  ;;  %853 = vmatpush.msra.mxu1 %v368_v40 }
  0x45   : > { %v500_v42 = vld [vmem:[#allocation2 + $0x6c0] sm:$0xff]  ;;  %873 = vmatpush.msra.mxu2 %v432_v41 }
  0x46   : > { %v300_v43 = vld [vmem:[#allocation2 + $0x80] sm:$0xff]  ;;  %892 = vmatpush.msra.mxu3 %v500_v42 }
  0x47   : > { %v364_v44 = vld [vmem:[#allocation2 + $0x280] sm:$0xff]  ;;  %834 = vmatpush.msra.mxu0 %v300_v43 }
  0x48   : > { %v428_v45 = vld [vmem:[#allocation2 + $0x480] sm:$0xff]  ;;  %854 = vmatpush.msra.mxu1 %v364_v44 }
  0x49   : > { %v496_v46 = vld [vmem:[#allocation2 + $0x6a0] sm:$0xff]  ;;  %874 = vmatpush.msra.mxu2 %v428_v45 }
  0x4a   : > { %v296_v47 = vld [vmem:[#allocation2 + $0x60] sm:$0xff]  ;;  %893 = vmatpush.msra.mxu3 %v496_v46 }
  0x4b   : > { %v360_v48 = vld [vmem:[#allocation2 + $0x260] sm:$0xff]  ;;  %835 = vmatpush.msra.mxu0 %v296_v47 }
  0x4c   : > { %v424_v49 = vld [vmem:[#allocation2 + $0x460] sm:$0xff]  ;;  %855 = vmatpush.msra.mxu1 %v360_v48 }
  0x4d   : > { %v492_v50 = vld [vmem:[#allocation2 + $0x680] sm:$0xff]  ;;  %875 = vmatpush.msra.mxu2 %v424_v49 }
  0x4e   : > { %v292_v51 = vld [vmem:[#allocation2 + $0x40] sm:$0xff]  ;;  %894 = vmatpush.msra.mxu3 %v492_v50 }
  0x4f   : > { %v356_v52 = vld [vmem:[#allocation2 + $0x240] sm:$0xff]  ;;  %836 = vmatpush.msra.mxu0 %v292_v51 }
  0x50   : > { %v420_v53 = vld [vmem:[#allocation2 + $0x440] sm:$0xff]  ;;  %856 = vmatpush.msra.mxu1 %v356_v52 }
  0x51   : > { %v488_v54 = vld [vmem:[#allocation2 + $0x660] sm:$0xff]  ;;  %876 = vmatpush.msra.mxu2 %v420_v53 }
  0x52   : > { %v288_v55 = vld [vmem:[#allocation2 + $0x20] sm:$0xff]  ;;  %895 = vmatpush.msra.mxu3 %v488_v54 }
  0x53   : > { %v352_v56 = vld [vmem:[#allocation2 + $0x220] sm:$0xff]  ;;  %837 = vmatpush.msra.mxu0 %v288_v55 }
  0x54   : > { %v416_v57 = vld [vmem:[#allocation2 + $0x420] sm:$0xff]  ;;  %857 = vmatpush.msra.mxu1 %v352_v56 }
  0x55   : > { %v484_v58 = vld [vmem:[#allocation2 + $0x640] sm:$0xff]  ;;  %877 = vmatpush.msra.mxu2 %v416_v57 }
  0x56   : > { %v284_v59 = vld [vmem:[#allocation2] sm:$0xff]  ;;  %896 = vmatpush.msra.mxu3 %v484_v58 }
  0x57   : > { %v348_v60 = vld [vmem:[#allocation2 + $0x200] sm:$0xff]  ;;  %838 = vmatpush.msra.mxu0 %v284_v59 }
  0x58   : > { %v412_v61 = vld [vmem:[#allocation2 + $0x400] sm:$0xff]  ;;  %858 = vmatpush.msra.mxu1 %v348_v60 }
  0x59   : > { %v480_v62 = vld [vmem:[#allocation2 + $0x620] sm:$0xff]  ;;  %878 = vmatpush.msra.mxu2 %v412_v61 }
  0x5a   : > { %v600_v63 = vld [vmem:[#allocation2 + $0x9e0] sm:$0xff]  ;;  %897 = vmatpush.msra.mxu3 %v480_v62 }
  0x5b   : > { %v664_v0 = vld [vmem:[#allocation2 + $0xbe0] sm:$0xff]  ;;  %903 = vmatpush.msrb.mxu0 %v600_v63 }
  0x5c   : > { %v728_v1 = vld [vmem:[#allocation2 + $0xde0] sm:$0xff]  ;;  %923 = vmatpush.msrb.mxu1 %v664_v0 }
  0x5d   : > { %v476_v2 = vld [vmem:[#allocation2 + $0x600] sm:$0xff]  ;;  %943 = vmatpush.msrb.mxu2 %v728_v1 }
  0x5e   : > { %v596_v3 = vld [vmem:[#allocation2 + $0x9c0] sm:$0xff]  ;;  %898 = vmatpush.msra.mxu3 %v476_v2 }
  0x5f   : > { %v660_v4 = vld [vmem:[#allocation2 + $0xbc0] sm:$0xff]  ;;  %904 = vmatpush.msrb.mxu0 %v596_v3  ;;  %v345_v3 = vld [vmem:[#allocation2 + $0x1e8] sm:$0xff] }
  0x60   : > { %v724_v5 = vld [vmem:[#allocation2 + $0xdc0] sm:$0xff]  ;;  %924 = vmatpush.msrb.mxu1 %v660_v4  ;;  %v409_v4 = vld [vmem:[#allocation2 + $0x3e8] sm:$0xff] }
  0x61   : > { %v792_v6 = vld [vmem:[#allocation2 + $0xfe0] sm:$0xff]  ;;  %944 = vmatpush.msrb.mxu2 %v724_v5  ;;  %v473_v5 = vld [vmem:[#allocation2 + $0x5e8] sm:$0xff] }
  0x62   : > { %v592_v7 = vld [vmem:[#allocation2 + $0x9a0] sm:$0xff]  ;;  %963 = vmatpush.msrb.mxu3 %v792_v6 }
  0x63   : > { %v656_v8 = vld [vmem:[#allocation2 + $0xba0] sm:$0xff]  ;;  %905 = vmatpush.msrb.mxu0 %v592_v7 }
  0x64   : > { %v720_v9 = vld [vmem:[#allocation2 + $0xda0] sm:$0xff]  ;;  %925 = vmatpush.msrb.mxu1 %v656_v8  ;;  %v341_v8 = vld [vmem:[#allocation2 + $0x1c8] sm:$0xff] }
  0x65   : > { %v788_v10 = vld [vmem:[#allocation2 + $0xfc0] sm:$0xff]  ;;  %945 = vmatpush.msrb.mxu2 %v720_v9  ;;  %v405_v9 = vld [vmem:[#allocation2 + $0x3c8] sm:$0xff] }
  0x66   : > { %v588_v11 = vld [vmem:[#allocation2 + $0x980] sm:$0xff]  ;;  %964 = vmatpush.msrb.mxu3 %v788_v10  ;;  %v469_v10 = vld [vmem:[#allocation2 + $0x5c8] sm:$0xff] }
  0x67   : > { %v652_v12 = vld [vmem:[#allocation2 + $0xb80] sm:$0xff]  ;;  %906 = vmatpush.msrb.mxu0 %v588_v11  ;;  %v537_v11 = vld [vmem:[#allocation2 + $0x7e8] sm:$0xff] }
  0x68   : > { %v716_v13 = vld [vmem:[#allocation2 + $0xd80] sm:$0xff]  ;;  %926 = vmatpush.msrb.mxu1 %v652_v12  ;;  %v337_v12 = vld [vmem:[#allocation2 + $0x1a8] sm:$0xff] }
  0x69   : > { %v784_v14 = vld [vmem:[#allocation2 + $0xfa0] sm:$0xff]  ;;  %946 = vmatpush.msrb.mxu2 %v716_v13  ;;  %v401_v13 = vld [vmem:[#allocation2 + $0x3a8] sm:$0xff] }
  0x6a   : > { %v584_v15 = vld [vmem:[#allocation2 + $0x960] sm:$0xff]  ;;  %965 = vmatpush.msrb.mxu3 %v784_v14  ;;  %v465_v14 = vld [vmem:[#allocation2 + $0x5a8] sm:$0xff] }
  0x6b   : > { %v648_v16 = vld [vmem:[#allocation2 + $0xb60] sm:$0xff]  ;;  %907 = vmatpush.msrb.mxu0 %v584_v15  ;;  %v533_v15 = vld [vmem:[#allocation2 + $0x7c8] sm:$0xff] }
  0x6c   : > { %v712_v17 = vld [vmem:[#allocation2 + $0xd60] sm:$0xff]  ;;  %927 = vmatpush.msrb.mxu1 %v648_v16  ;;  %v333_v16 = vld [vmem:[#allocation2 + $0x188] sm:$0xff] }
  0x6d   : > { %v780_v18 = vld [vmem:[#allocation2 + $0xf80] sm:$0xff]  ;;  %947 = vmatpush.msrb.mxu2 %v712_v17  ;;  %v397_v17 = vld [vmem:[#allocation2 + $0x388] sm:$0xff] }
  0x6e   : > { %v580_v19 = vld [vmem:[#allocation2 + $0x940] sm:$0xff]  ;;  %966 = vmatpush.msrb.mxu3 %v780_v18  ;;  %v461_v18 = vld [vmem:[#allocation2 + $0x588] sm:$0xff] }
  0x6f   : > { %v644_v20 = vld [vmem:[#allocation2 + $0xb40] sm:$0xff]  ;;  %908 = vmatpush.msrb.mxu0 %v580_v19  ;;  %v529_v19 = vld [vmem:[#allocation2 + $0x7a8] sm:$0xff] }
  0x70   : > { %v708_v21 = vld [vmem:[#allocation2 + $0xd40] sm:$0xff]  ;;  %928 = vmatpush.msrb.mxu1 %v644_v20 }
  0x71   : > { %v776_v22 = vld [vmem:[#allocation2 + $0xf60] sm:$0xff]  ;;  %948 = vmatpush.msrb.mxu2 %v708_v21  ;;  %v329_v21 = vld [vmem:[#allocation2 + $0x168] sm:$0xff] }
  0x72   : > { %v576_v23 = vld [vmem:[#allocation2 + $0x920] sm:$0xff]  ;;  %967 = vmatpush.msrb.mxu3 %v776_v22  ;;  %v393_v22 = vld [vmem:[#allocation2 + $0x368] sm:$0xff] }
  0x73   : > { %v640_v24 = vld [vmem:[#allocation2 + $0xb20] sm:$0xff]  ;;  %909 = vmatpush.msrb.mxu0 %v576_v23  ;;  %v457_v23 = vld [vmem:[#allocation2 + $0x568] sm:$0xff] }
  0x74   : > { %v704_v25 = vld [vmem:[#allocation2 + $0xd20] sm:$0xff]  ;;  %929 = vmatpush.msrb.mxu1 %v640_v24 }
  0x75   : > { %v772_v26 = vld [vmem:[#allocation2 + $0xf40] sm:$0xff]  ;;  %949 = vmatpush.msrb.mxu2 %v704_v25  ;;  %v525_v25 = vld [vmem:[#allocation2 + $0x788] sm:$0xff] }
  0x76   : > { %v572_v27 = vld [vmem:[#allocation2 + $0x900] sm:$0xff]  ;;  %968 = vmatpush.msrb.mxu3 %v772_v26 }
  0x77   : > { %v636_v28 = vld [vmem:[#allocation2 + $0xb00] sm:$0xff]  ;;  %910 = vmatpush.msrb.mxu0 %v572_v27  ;;  %v325_v27 = vld [vmem:[#allocation2 + $0x148] sm:$0xff] }
  0x78   : > { %v700_v29 = vld [vmem:[#allocation2 + $0xd00] sm:$0xff]  ;;  %930 = vmatpush.msrb.mxu1 %v636_v28  ;;  %v389_v28 = vld [vmem:[#allocation2 + $0x348] sm:$0xff] }
  0x79   : > { %v768_v30 = vld [vmem:[#allocation2 + $0xf20] sm:$0xff]  ;;  %950 = vmatpush.msrb.mxu2 %v700_v29  ;;  %v453_v29 = vld [vmem:[#allocation2 + $0x548] sm:$0xff] }
  0x7a   : > { %v568_v31 = vld [vmem:[#allocation2 + $0x8e0] sm:$0xff]  ;;  %969 = vmatpush.msrb.mxu3 %v768_v30 }
  0x7b   : > { %v632_v32 = vld [vmem:[#allocation2 + $0xae0] sm:$0xff]  ;;  %911 = vmatpush.msrb.mxu0 %v568_v31  ;;  %v521_v31 = vld [vmem:[#allocation2 + $0x768] sm:$0xff] }
  0x7c   : > { %v696_v33 = vld [vmem:[#allocation2 + $0xce0] sm:$0xff]  ;;  %931 = vmatpush.msrb.mxu1 %v632_v32  ;;  %v321_v32 = vld [vmem:[#allocation2 + $0x128] sm:$0xff] }
  0x7d   : > { %v764_v34 = vld [vmem:[#allocation2 + $0xf00] sm:$0xff]  ;;  %951 = vmatpush.msrb.mxu2 %v696_v33  ;;  %v385_v33 = vld [vmem:[#allocation2 + $0x328] sm:$0xff] }
  0x7e   : > { %v564_v35 = vld [vmem:[#allocation2 + $0x8c0] sm:$0xff]  ;;  %970 = vmatpush.msrb.mxu3 %v764_v34  ;;  %v449_v34 = vld [vmem:[#allocation2 + $0x528] sm:$0xff] }
  0x7f   : > { %v628_v36 = vld [vmem:[#allocation2 + $0xac0] sm:$0xff]  ;;  %912 = vmatpush.msrb.mxu0 %v564_v35  ;;  %v517_v35 = vld [vmem:[#allocation2 + $0x748] sm:$0xff] }
  0x80   : > { %v692_v37 = vld [vmem:[#allocation2 + $0xcc0] sm:$0xff]  ;;  %932 = vmatpush.msrb.mxu1 %v628_v36  ;;  %v317_v36 = vld [vmem:[#allocation2 + $0x108] sm:$0xff] }
  0x81   : > { %v760_v38 = vld [vmem:[#allocation2 + $0xee0] sm:$0xff]  ;;  %952 = vmatpush.msrb.mxu2 %v692_v37  ;;  %v381_v37 = vld [vmem:[#allocation2 + $0x308] sm:$0xff] }
  0x82   : > { %v560_v39 = vld [vmem:[#allocation2 + $0x8a0] sm:$0xff]  ;;  %971 = vmatpush.msrb.mxu3 %v760_v38  ;;  %v445_v38 = vld [vmem:[#allocation2 + $0x508] sm:$0xff] }
  0x83   : > { %v624_v40 = vld [vmem:[#allocation2 + $0xaa0] sm:$0xff]  ;;  %913 = vmatpush.msrb.mxu0 %v560_v39  ;;  %v513_v39 = vld [vmem:[#allocation2 + $0x728] sm:$0xff] }
  0x84   : > { %v688_v41 = vld [vmem:[#allocation2 + $0xca0] sm:$0xff]  ;;  %933 = vmatpush.msrb.mxu1 %v624_v40  ;;  %v313_v40 = vld [vmem:[#allocation2 + $0xe8] sm:$0xff] }
  0x85   : > { %v756_v42 = vld [vmem:[#allocation2 + $0xec0] sm:$0xff]  ;;  %953 = vmatpush.msrb.mxu2 %v688_v41  ;;  %v377_v41 = vld [vmem:[#allocation2 + $0x2e8] sm:$0xff] }
  0x86   : > { %v556_v43 = vld [vmem:[#allocation2 + $0x880] sm:$0xff]  ;;  %972 = vmatpush.msrb.mxu3 %v756_v42  ;;  %v441_v42 = vld [vmem:[#allocation2 + $0x4e8] sm:$0xff] }
  0x87   : > { %v620_v44 = vld [vmem:[#allocation2 + $0xa80] sm:$0xff]  ;;  %914 = vmatpush.msrb.mxu0 %v556_v43  ;;  %v509_v43 = vld [vmem:[#allocation2 + $0x708] sm:$0xff] }
  0x88   : > { %v684_v45 = vld [vmem:[#allocation2 + $0xc80] sm:$0xff]  ;;  %934 = vmatpush.msrb.mxu1 %v620_v44  ;;  %v309_v44 = vld [vmem:[#allocation2 + $0xc8] sm:$0xff] }
  0x89   : > { %v752_v46 = vld [vmem:[#allocation2 + $0xea0] sm:$0xff]  ;;  %954 = vmatpush.msrb.mxu2 %v684_v45  ;;  %v373_v45 = vld [vmem:[#allocation2 + $0x2c8] sm:$0xff] }
  0x8a   : > { %v552_v47 = vld [vmem:[#allocation2 + $0x860] sm:$0xff]  ;;  %973 = vmatpush.msrb.mxu3 %v752_v46  ;;  %v437_v46 = vld [vmem:[#allocation2 + $0x4c8] sm:$0xff] }
  0x8b   : > { %v616_v48 = vld [vmem:[#allocation2 + $0xa60] sm:$0xff]  ;;  %915 = vmatpush.msrb.mxu0 %v552_v47  ;;  %v505_v47 = vld [vmem:[#allocation2 + $0x6e8] sm:$0xff] }
  0x8c   : > { %v680_v49 = vld [vmem:[#allocation2 + $0xc60] sm:$0xff]  ;;  %935 = vmatpush.msrb.mxu1 %v616_v48  ;;  %v305_v48 = vld [vmem:[#allocation2 + $0xa8] sm:$0xff] }
  0x8d   : > { %v748_v50 = vld [vmem:[#allocation2 + $0xe80] sm:$0xff]  ;;  %955 = vmatpush.msrb.mxu2 %v680_v49  ;;  %v369_v49 = vld [vmem:[#allocation2 + $0x2a8] sm:$0xff] }
  0x8e   : > { %v548_v51 = vld [vmem:[#allocation2 + $0x840] sm:$0xff]  ;;  %974 = vmatpush.msrb.mxu3 %v748_v50  ;;  %v433_v50 = vld [vmem:[#allocation2 + $0x4a8] sm:$0xff] }
  0x8f   : > { %v612_v52 = vld [vmem:[#allocation2 + $0xa40] sm:$0xff]  ;;  %916 = vmatpush.msrb.mxu0 %v548_v51  ;;  %v501_v51 = vld [vmem:[#allocation2 + $0x6c8] sm:$0xff] }
  0x90   : > { %v676_v53 = vld [vmem:[#allocation2 + $0xc40] sm:$0xff]  ;;  %936 = vmatpush.msrb.mxu1 %v612_v52  ;;  %v301_v52 = vld [vmem:[#allocation2 + $0x88] sm:$0xff] }
  0x91   : > { %v744_v54 = vld [vmem:[#allocation2 + $0xe60] sm:$0xff]  ;;  %956 = vmatpush.msrb.mxu2 %v676_v53  ;;  %v365_v53 = vld [vmem:[#allocation2 + $0x288] sm:$0xff] }
  0x92   : > { %v544_v55 = vld [vmem:[#allocation2 + $0x820] sm:$0xff]  ;;  %975 = vmatpush.msrb.mxu3 %v744_v54  ;;  %v429_v54 = vld [vmem:[#allocation2 + $0x488] sm:$0xff] }
  0x93   : > { %v608_v56 = vld [vmem:[#allocation2 + $0xa20] sm:$0xff]  ;;  %917 = vmatpush.msrb.mxu0 %v544_v55  ;;  %v497_v55 = vld [vmem:[#allocation2 + $0x6a8] sm:$0xff] }
  0x94   : > { %v2183_v57 = vld [vmem:[%s278_s26] sm:$0xff]  ;;  %937 = vmatpush.msrb.mxu1 %v608_v56  ;;  %v297_v56 = vld [vmem:[#allocation2 + $0x68] sm:$0xff] }
  0x95   : > { %v672_v58 = vld [vmem:[#allocation2 + $0xc20] sm:$0xff]  ;;  %v2186_v0 = vperm.slane %v2183_v57, 0  ;;  %v2189_v1 = vperm.slane %v2183_v57, 1  ;;  %v2192_v2 = vperm.slane %v2183_v57, 2  ;;  %v2197_v7 = vperm.slane %v2183_v57, 3 }
  0x96   : > { %v740_v59 = vld [vmem:[#allocation2 + $0xe40] sm:$0xff]  ;;  %957 = vmatpush.msrb.mxu2 %v672_v58  ;;  %v2202_v20 = vperm.slane %v2183_v57, 6  ;;  %v2205_v24 = vperm.slane %v2183_v57, 4  ;;  %v2208_v26 = vperm.slane %v2183_v57, 7  ;;  %v2212_v30 = vperm.slane %v2183_v57, 5  ;;  %v361_v57 = vld [vmem:[#allocation2 + $0x268] sm:$0xff] }
  0x97   : > { %v540_v60 = vld [vmem:[#allocation2 + $0x800] sm:$0xff]  ;;  %976 = vmatpush.msrb.mxu3 %v740_v59  ;;  %839 = vmatmul.f32.vlgmr.msra.gmra.mxu0 %v2186_v0  ;;  %v425_v58 = vld [vmem:[#allocation2 + $0x468] sm:$0xff] }
  0x98   : > { %v604_v61 = vld [vmem:[#allocation2 + $0xa00] sm:$0xff]  ;;  %918 = vmatpush.msrb.mxu0 %v540_v60  ;;  %859 = vmatmul.f32.vlgmr.msra.gmra.mxu1 %v2189_v1  ;;  %v493_v59 = vld [vmem:[#allocation2 + $0x688] sm:$0xff] }
  0x99   : > { %v668_v62 = vld [vmem:[#allocation2 + $0xc00] sm:$0xff]  ;;  %938 = vmatpush.msrb.mxu1 %v604_v61  ;;  %879 = vmatmul.f32.vlgmr.msra.gmra.mxu2 %v2192_v2  ;;  %v293_v60 = vld [vmem:[#allocation2 + $0x48] sm:$0xff] }
  0x9a   : > { %v736_v63 = vld [vmem:[#allocation2 + $0xe20] sm:$0xff]  ;;  %958 = vmatpush.msrb.mxu2 %v668_v62  ;;  %983 = vmatpush.msra.mxu0 %v345_v3  ;;  %v357_v61 = vld [vmem:[#allocation2 + $0x248] sm:$0xff] }
  0x9b   : > { %977 = vmatpush.msrb.mxu3 %v736_v63  ;;  %v732_v6 = vld [vmem:[#allocation2 + $0xe00] sm:$0xff]  ;;  %1003 = vmatpush.msra.mxu1 %v409_v4  ;;  %v421_v62 = vld [vmem:[#allocation2 + $0x448] sm:$0xff] }
  0x9c   : > { %1023 = vmatpush.msra.mxu2 %v473_v5  ;;  %984 = vmatpush.msra.mxu0 %v341_v8  ;;  %v489_v63 = vld [vmem:[#allocation2 + $0x668] sm:$0xff] }
  0x9d   : > { %978 = vmatpush.msrb.mxu3 %v732_v6  ;;  %1004 = vmatpush.msra.mxu1 %v405_v9  ;;  %v289_v3 = vld [vmem:[#allocation2 + $0x28] sm:$0xff] }
  0x9e   : > { %899 = vmatmul.f32.vlgmr.msra.gmra.mxu3 %v2197_v7  ;;  %1024 = vmatpush.msra.mxu2 %v469_v10  ;;  %v353_v4 = vld [vmem:[#allocation2 + $0x228] sm:$0xff] }
  0x9f   : > { %1043 = vmatpush.msra.mxu3 %v537_v11  ;;  %985 = vmatpush.msra.mxu0 %v337_v12  ;;  %v417_v5 = vld [vmem:[#allocation2 + $0x428] sm:$0xff] }
  0xa0   : > { %1005 = vmatpush.msra.mxu1 %v401_v13  ;;  %1025 = vmatpush.msra.mxu2 %v465_v14  ;;  %v485_v6 = vld [vmem:[#allocation2 + $0x648] sm:$0xff] }
  0xa1   : > { %1044 = vmatpush.msra.mxu3 %v533_v15  ;;  %986 = vmatpush.msra.mxu0 %v333_v16  ;;  %v285_v8 = vld [vmem:[#allocation2 + $0x8] sm:$0xff] }
  0xa2   : > { %1006 = vmatpush.msra.mxu1 %v397_v17  ;;  %1026 = vmatpush.msra.mxu2 %v461_v18  ;;  %v349_v9 = vld [vmem:[#allocation2 + $0x208] sm:$0xff] }
  0xa3   : > { %1045 = vmatpush.msra.mxu3 %v529_v19  ;;  %959 = vmatmul.f32.vlgmr.msrb.gmra.mxu2 %v2202_v20  ;;  %v413_v10 = vld [vmem:[#allocation2 + $0x408] sm:$0xff] }
  0xa4   : > { %987 = vmatpush.msra.mxu0 %v329_v21  ;;  %1007 = vmatpush.msra.mxu1 %v393_v22  ;;  %v481_v11 = vld [vmem:[#allocation2 + $0x628] sm:$0xff] }
  0xa5   : > { %1027 = vmatpush.msra.mxu2 %v457_v23  ;;  %1046 = vmatpush.msra.mxu3 %v525_v25  ;;  %v601_v12 = vld [vmem:[#allocation2 + $0x9e8] sm:$0xff] }
  0xa6   : > { %919 = vmatmul.f32.vlgmr.msrb.gmra.mxu0 %v2205_v24  ;;  %979 = vmatmul.f32.vlgmr.msrb.gmra.mxu3 %v2208_v26  ;;  %v665_v13 = vld [vmem:[#allocation2 + $0xbe8] sm:$0xff] }
  0xa7   : > { %988 = vmatpush.msra.mxu0 %v325_v27  ;;  %1008 = vmatpush.msra.mxu1 %v389_v28  ;;  %v729_v14 = vld [vmem:[#allocation2 + $0xde8] sm:$0xff] }
  0xa8   : > { %1028 = vmatpush.msra.mxu2 %v453_v29  ;;  %1047 = vmatpush.msra.mxu3 %v521_v31  ;;  %v477_v15 = vld [vmem:[#allocation2 + $0x608] sm:$0xff] }
  0xa9   : > { %939 = vmatmul.f32.vlgmr.msrb.gmra.mxu1 %v2212_v30  ;;  %989 = vmatpush.msra.mxu0 %v321_v32  ;;  %v597_v16 = vld [vmem:[#allocation2 + $0x9c8] sm:$0xff] }
  0xaa   : > { %1009 = vmatpush.msra.mxu1 %v385_v33  ;;  %1029 = vmatpush.msra.mxu2 %v449_v34  ;;  %v661_v17 = vld [vmem:[#allocation2 + $0xbc8] sm:$0xff] }
  0xab   : > { %1048 = vmatpush.msra.mxu3 %v517_v35  ;;  %990 = vmatpush.msra.mxu0 %v317_v36  ;;  %v725_v18 = vld [vmem:[#allocation2 + $0xdc8] sm:$0xff] }
  0xac   : > { %1010 = vmatpush.msra.mxu1 %v381_v37  ;;  %1030 = vmatpush.msra.mxu2 %v445_v38  ;;  %v793_v19 = vld [vmem:[#allocation2 + $0xfe8] sm:$0xff] }
  0xad   : > { %1049 = vmatpush.msra.mxu3 %v513_v39  ;;  %991 = vmatpush.msra.mxu0 %v313_v40  ;;  %v593_v21 = vld [vmem:[#allocation2 + $0x9a8] sm:$0xff] }
  0xae   : > { %1011 = vmatpush.msra.mxu1 %v377_v41  ;;  %1031 = vmatpush.msra.mxu2 %v441_v42  ;;  %v657_v22 = vld [vmem:[#allocation2 + $0xba8] sm:$0xff] }
  0xaf   : > { %1050 = vmatpush.msra.mxu3 %v509_v43  ;;  %992 = vmatpush.msra.mxu0 %v309_v44  ;;  %v721_v23 = vld [vmem:[#allocation2 + $0xda8] sm:$0xff] }
  0xb0   : > { %1012 = vmatpush.msra.mxu1 %v373_v45  ;;  %1032 = vmatpush.msra.mxu2 %v437_v46  ;;  %v789_v25 = vld [vmem:[#allocation2 + $0xfc8] sm:$0xff] }
  0xb1   : > { %1051 = vmatpush.msra.mxu3 %v505_v47  ;;  %993 = vmatpush.msra.mxu0 %v305_v48  ;;  %v589_v27 = vld [vmem:[#allocation2 + $0x988] sm:$0xff] }
  0xb2   : > { %1013 = vmatpush.msra.mxu1 %v369_v49  ;;  %1033 = vmatpush.msra.mxu2 %v433_v50  ;;  %v653_v28 = vld [vmem:[#allocation2 + $0xb88] sm:$0xff] }
  0xb3   : > { %1052 = vmatpush.msra.mxu3 %v501_v51  ;;  %994 = vmatpush.msra.mxu0 %v301_v52  ;;  %v717_v29 = vld [vmem:[#allocation2 + $0xd88] sm:$0xff] }
  0xb4   : > { %1014 = vmatpush.msra.mxu1 %v365_v53  ;;  %1034 = vmatpush.msra.mxu2 %v429_v54  ;;  %v785_v31 = vld [vmem:[#allocation2 + $0xfa8] sm:$0xff] }
  0xb5   : > { %1053 = vmatpush.msra.mxu3 %v497_v55  ;;  %995 = vmatpush.msra.mxu0 %v297_v56  ;;  %v585_v32 = vld [vmem:[#allocation2 + $0x968] sm:$0xff] }
  0xb6   : > { %1015 = vmatpush.msra.mxu1 %v361_v57  ;;  %1035 = vmatpush.msra.mxu2 %v425_v58  ;;  %v649_v33 = vld [vmem:[#allocation2 + $0xb68] sm:$0xff] }
  0xb7   : > { %1054 = vmatpush.msra.mxu3 %v493_v59  ;;  %996 = vmatpush.msra.mxu0 %v293_v60  ;;  %v713_v34 = vld [vmem:[#allocation2 + $0xd68] sm:$0xff] }
  0xb8   : > { %1016 = vmatpush.msra.mxu1 %v357_v61  ;;  %1036 = vmatpush.msra.mxu2 %v421_v62  ;;  %v781_v35 = vld [vmem:[#allocation2 + $0xf88] sm:$0xff] }
  0xb9   : > { %1055 = vmatpush.msra.mxu3 %v489_v63  ;;  %997 = vmatpush.msra.mxu0 %v289_v3  ;;  %v581_v36 = vld [vmem:[#allocation2 + $0x948] sm:$0xff] }
  0xba   : > { %1017 = vmatpush.msra.mxu1 %v353_v4  ;;  %1037 = vmatpush.msra.mxu2 %v417_v5  ;;  %v645_v37 = vld [vmem:[#allocation2 + $0xb48] sm:$0xff] }
  0xbb   : > { %1056 = vmatpush.msra.mxu3 %v485_v6  ;;  %998 = vmatpush.msra.mxu0 %v285_v8  ;;  %v709_v38 = vld [vmem:[#allocation2 + $0xd48] sm:$0xff] }
  0xbc   : > { %1018 = vmatpush.msra.mxu1 %v349_v9  ;;  %1038 = vmatpush.msra.mxu2 %v413_v10  ;;  %v777_v39 = vld [vmem:[#allocation2 + $0xf68] sm:$0xff] }
  0xbd   : > { %1057 = vmatpush.msra.mxu3 %v481_v11  ;;  %1063 = vmatpush.msrb.mxu0 %v601_v12  ;;  %v577_v40 = vld [vmem:[#allocation2 + $0x928] sm:$0xff] }
  0xbe   : > { %1083 = vmatpush.msrb.mxu1 %v665_v13  ;;  %1103 = vmatpush.msrb.mxu2 %v729_v14  ;;  %v641_v41 = vld [vmem:[#allocation2 + $0xb28] sm:$0xff] }
  0xbf   : > { %1058 = vmatpush.msra.mxu3 %v477_v15  ;;  %1064 = vmatpush.msrb.mxu0 %v597_v16  ;;  %v705_v42 = vld [vmem:[#allocation2 + $0xd28] sm:$0xff] }
  0xc0   : > { %1084 = vmatpush.msrb.mxu1 %v661_v17  ;;  %1104 = vmatpush.msrb.mxu2 %v725_v18  ;;  %v773_v43 = vld [vmem:[#allocation2 + $0xf48] sm:$0xff] }
  0xc1   : > { %1123 = vmatpush.msrb.mxu3 %v793_v19  ;;  %1065 = vmatpush.msrb.mxu0 %v593_v21  ;;  %v573_v44 = vld [vmem:[#allocation2 + $0x908] sm:$0xff]  ;;  %v346_v21 = vld [vmem:[#allocation2 + $0x1f0] sm:$0xff] }
  0xc2   : > { %1085 = vmatpush.msrb.mxu1 %v657_v22  ;;  %1105 = vmatpush.msrb.mxu2 %v721_v23  ;;  %v637_v45 = vld [vmem:[#allocation2 + $0xb08] sm:$0xff]  ;;  %v410_v22 = vld [vmem:[#allocation2 + $0x3f0] sm:$0xff] }
  0xc3   : > { %1124 = vmatpush.msrb.mxu3 %v789_v25  ;;  %1066 = vmatpush.msrb.mxu0 %v589_v27  ;;  %v701_v46 = vld [vmem:[#allocation2 + $0xd08] sm:$0xff]  ;;  %v474_v23 = vld [vmem:[#allocation2 + $0x5f0] sm:$0xff] }
  0xc4   : > { %1086 = vmatpush.msrb.mxu1 %v653_v28  ;;  %1106 = vmatpush.msrb.mxu2 %v717_v29  ;;  %v769_v47 = vld [vmem:[#allocation2 + $0xf28] sm:$0xff]  ;;  %v342_v27 = vld [vmem:[#allocation2 + $0x1d0] sm:$0xff] }
  0xc5   : > { %1125 = vmatpush.msrb.mxu3 %v785_v31  ;;  %1067 = vmatpush.msrb.mxu0 %v585_v32  ;;  %v569_v48 = vld [vmem:[#allocation2 + $0x8e8] sm:$0xff]  ;;  %v406_v28 = vld [vmem:[#allocation2 + $0x3d0] sm:$0xff] }
  0xc6   : > { %1087 = vmatpush.msrb.mxu1 %v649_v33  ;;  %1107 = vmatpush.msrb.mxu2 %v713_v34  ;;  %v633_v49 = vld [vmem:[#allocation2 + $0xae8] sm:$0xff]  ;;  %v470_v29 = vld [vmem:[#allocation2 + $0x5d0] sm:$0xff] }
  0xc7   : > { %1126 = vmatpush.msrb.mxu3 %v781_v35  ;;  %1068 = vmatpush.msrb.mxu0 %v581_v36  ;;  %v697_v50 = vld [vmem:[#allocation2 + $0xce8] sm:$0xff]  ;;  %v538_v31 = vld [vmem:[#allocation2 + $0x7f0] sm:$0xff] }
  0xc8   : > { %1088 = vmatpush.msrb.mxu1 %v645_v37  ;;  %1108 = vmatpush.msrb.mxu2 %v709_v38  ;;  %v765_v51 = vld [vmem:[#allocation2 + $0xf08] sm:$0xff]  ;;  %v338_v32 = vld [vmem:[#allocation2 + $0x1b0] sm:$0xff] }
  0xc9   : > { %1127 = vmatpush.msrb.mxu3 %v777_v39  ;;  %1069 = vmatpush.msrb.mxu0 %v577_v40  ;;  %v565_v52 = vld [vmem:[#allocation2 + $0x8c8] sm:$0xff]  ;;  %v402_v33 = vld [vmem:[#allocation2 + $0x3b0] sm:$0xff] }
  0xca   : > { %1089 = vmatpush.msrb.mxu1 %v641_v41  ;;  %1109 = vmatpush.msrb.mxu2 %v705_v42  ;;  %v629_v53 = vld [vmem:[#allocation2 + $0xac8] sm:$0xff]  ;;  %v466_v34 = vld [vmem:[#allocation2 + $0x5b0] sm:$0xff] }
  0xcb   : > { %1128 = vmatpush.msrb.mxu3 %v773_v43  ;;  %1070 = vmatpush.msrb.mxu0 %v573_v44  ;;  %v693_v54 = vld [vmem:[#allocation2 + $0xcc8] sm:$0xff]  ;;  %v534_v35 = vld [vmem:[#allocation2 + $0x7d0] sm:$0xff] }
  0xcc   : > { %1090 = vmatpush.msrb.mxu1 %v637_v45  ;;  %1110 = vmatpush.msrb.mxu2 %v701_v46  ;;  %v761_v55 = vld [vmem:[#allocation2 + $0xee8] sm:$0xff]  ;;  %v334_v36 = vld [vmem:[#allocation2 + $0x190] sm:$0xff] }
  0xcd   : > { %1129 = vmatpush.msrb.mxu3 %v769_v47  ;;  %1071 = vmatpush.msrb.mxu0 %v569_v48  ;;  %v561_v56 = vld [vmem:[#allocation2 + $0x8a8] sm:$0xff]  ;;  %v398_v37 = vld [vmem:[#allocation2 + $0x390] sm:$0xff] }
  0xce   : > { %1091 = vmatpush.msrb.mxu1 %v633_v49  ;;  %1111 = vmatpush.msrb.mxu2 %v697_v50  ;;  %v625_v57 = vld [vmem:[#allocation2 + $0xaa8] sm:$0xff]  ;;  %v462_v38 = vld [vmem:[#allocation2 + $0x590] sm:$0xff] }
  0xcf   : > { %1130 = vmatpush.msrb.mxu3 %v765_v51  ;;  %1072 = vmatpush.msrb.mxu0 %v565_v52  ;;  %v689_v58 = vld [vmem:[#allocation2 + $0xca8] sm:$0xff]  ;;  %v530_v39 = vld [vmem:[#allocation2 + $0x7b0] sm:$0xff] }
  0xd0   : > { %1092 = vmatpush.msrb.mxu1 %v629_v53  ;;  %v757_v59 = vld [vmem:[#allocation2 + $0xec8] sm:$0xff]  ;;  %1112 = vmatpush.msrb.mxu2 %v693_v54  ;;  %v330_v40 = vld [vmem:[#allocation2 + $0x170] sm:$0xff] }
  0xd1   : > { %1131 = vmatpush.msrb.mxu3 %v761_v55  ;;  %v557_v60 = vld [vmem:[#allocation2 + $0x888] sm:$0xff]  ;;  %1073 = vmatpush.msrb.mxu0 %v561_v56  ;;  %v394_v41 = vld [vmem:[#allocation2 + $0x370] sm:$0xff] }
  0xd2   : > { %v621_v61 = vld [vmem:[#allocation2 + $0xa88] sm:$0xff]  ;;  %1093 = vmatpush.msrb.mxu1 %v625_v57  ;;  %1113 = vmatpush.msrb.mxu2 %v689_v58  ;;  %v458_v42 = vld [vmem:[#allocation2 + $0x570] sm:$0xff] }
  0xd3   : > { %v685_v62 = vld [vmem:[#allocation2 + $0xc88] sm:$0xff]  ;;  %1132 = vmatpush.msrb.mxu3 %v757_v59  ;;  %1074 = vmatpush.msrb.mxu0 %v557_v60  ;;  %v526_v43 = vld [vmem:[#allocation2 + $0x790] sm:$0xff] }
  0xd4   : > { %v753_v63 = vld [vmem:[#allocation2 + $0xea8] sm:$0xff]  ;;  %1094 = vmatpush.msrb.mxu1 %v621_v61  ;;  %1114 = vmatpush.msrb.mxu2 %v685_v62  ;;  %v326_v44 = vld [vmem:[#allocation2 + $0x150] sm:$0xff] }
  0xd5   : > { %v553_v3 = vld [vmem:[#allocation2 + $0x868] sm:$0xff]  ;;  %1133 = vmatpush.msrb.mxu3 %v753_v63  ;;  %999 = vmatmul.f32.vlgmr.msra.gmra.mxu0 %v2186_v0  ;;  %v390_v45 = vld [vmem:[#allocation2 + $0x350] sm:$0xff] }
  0xd6   : > { %v617_v4 = vld [vmem:[#allocation2 + $0xa68] sm:$0xff]  ;;  %1075 = vmatpush.msrb.mxu0 %v553_v3  ;;  %1019 = vmatmul.f32.vlgmr.msra.gmra.mxu1 %v2189_v1  ;;  %v454_v46 = vld [vmem:[#allocation2 + $0x550] sm:$0xff] }
  0xd7   : > { %v681_v5 = vld [vmem:[#allocation2 + $0xc68] sm:$0xff]  ;;  %1095 = vmatpush.msrb.mxu1 %v617_v4  ;;  %1039 = vmatmul.f32.vlgmr.msra.gmra.mxu2 %v2192_v2  ;;  %v522_v47 = vld [vmem:[#allocation2 + $0x770] sm:$0xff] }
  0xd8   : > { %v749_v6 = vld [vmem:[#allocation2 + $0xe88] sm:$0xff]  ;;  %1115 = vmatpush.msrb.mxu2 %v681_v5  ;;  %1059 = vmatmul.f32.vlgmr.msra.gmra.mxu3 %v2197_v7  ;;  %v322_v48 = vld [vmem:[#allocation2 + $0x130] sm:$0xff] }
  0xd9   : > { %v549_v8 = vld [vmem:[#allocation2 + $0x848] sm:$0xff]  ;;  %1134 = vmatpush.msrb.mxu3 %v749_v6  ;;  %v386_v49 = vld [vmem:[#allocation2 + $0x330] sm:$0xff] }
  0xda   : > { %v613_v9 = vld [vmem:[#allocation2 + $0xa48] sm:$0xff]  ;;  %1076 = vmatpush.msrb.mxu0 %v549_v8  ;;  %v450_v50 = vld [vmem:[#allocation2 + $0x530] sm:$0xff] }
  0xdb   : > { %v677_v10 = vld [vmem:[#allocation2 + $0xc48] sm:$0xff]  ;;  %1096 = vmatpush.msrb.mxu1 %v613_v9  ;;  %v518_v51 = vld [vmem:[#allocation2 + $0x750] sm:$0xff] }
  0xdc   : > { %v745_v11 = vld [vmem:[#allocation2 + $0xe68] sm:$0xff]  ;;  %1116 = vmatpush.msrb.mxu2 %v677_v10  ;;  %v318_v52 = vld [vmem:[#allocation2 + $0x110] sm:$0xff] }
  0xdd   : > { %v545_v12 = vld [vmem:[#allocation2 + $0x828] sm:$0xff]  ;;  %1135 = vmatpush.msrb.mxu3 %v745_v11  ;;  %v382_v53 = vld [vmem:[#allocation2 + $0x310] sm:$0xff] }
  0xde   : > { %v609_v13 = vld [vmem:[#allocation2 + $0xa28] sm:$0xff]  ;;  %1077 = vmatpush.msrb.mxu0 %v545_v12  ;;  %v446_v54 = vld [vmem:[#allocation2 + $0x510] sm:$0xff] }
  0xdf   : > { %v673_v14 = vld [vmem:[#allocation2 + $0xc28] sm:$0xff]  ;;  %1097 = vmatpush.msrb.mxu1 %v609_v13  ;;  %v514_v55 = vld [vmem:[#allocation2 + $0x730] sm:$0xff] }
  0xe0   : > { %v741_v15 = vld [vmem:[#allocation2 + $0xe48] sm:$0xff]  ;;  %1117 = vmatpush.msrb.mxu2 %v673_v14  ;;  %v314_v56 = vld [vmem:[#allocation2 + $0xf0] sm:$0xff] }
  0xe1   : > { %v541_v16 = vld [vmem:[#allocation2 + $0x808] sm:$0xff]  ;;  %1136 = vmatpush.msrb.mxu3 %v741_v15  ;;  %v378_v57 = vld [vmem:[#allocation2 + $0x2f0] sm:$0xff] }
  0xe2   : > { %v605_v17 = vld [vmem:[#allocation2 + $0xa08] sm:$0xff]  ;;  %1078 = vmatpush.msrb.mxu0 %v541_v16  ;;  %v442_v58 = vld [vmem:[#allocation2 + $0x4f0] sm:$0xff] }
  0xe3   : > { %v669_v18 = vld [vmem:[#allocation2 + $0xc08] sm:$0xff]  ;;  %1098 = vmatpush.msrb.mxu1 %v605_v17  ;;  %1079 = vmatmul.f32.vlgmr.msrb.gmra.mxu0 %v2205_v24  ;;  %v510_v59 = vld [vmem:[#allocation2 + $0x710] sm:$0xff] }
  0xe4   : > { %v737_v19 = vld [vmem:[#allocation2 + $0xe28] sm:$0xff]  ;;  %1118 = vmatpush.msrb.mxu2 %v669_v18  ;;  %1143 = vmatpush.msra.mxu0 %v346_v21  ;;  %v310_v60 = vld [vmem:[#allocation2 + $0xd0] sm:$0xff] }
  0xe5   : > { %1137 = vmatpush.msrb.mxu3 %v737_v19  ;;  %v733_v25 = vld [vmem:[#allocation2 + $0xe08] sm:$0xff]  ;;  %1163 = vmatpush.msra.mxu1 %v410_v22  ;;  %v374_v61 = vld [vmem:[#allocation2 + $0x2d0] sm:$0xff] }
  0xe6   : > { %1183 = vmatpush.msra.mxu2 %v474_v23  ;;  %1144 = vmatpush.msra.mxu0 %v342_v27  ;;  %v438_v62 = vld [vmem:[#allocation2 + $0x4d0] sm:$0xff] }
  0xe7   : > { %1138 = vmatpush.msrb.mxu3 %v733_v25  ;;  %1164 = vmatpush.msra.mxu1 %v406_v28  ;;  %v506_v63 = vld [vmem:[#allocation2 + $0x6f0] sm:$0xff] }
  0xe8   : > { %1184 = vmatpush.msra.mxu2 %v470_v29  ;;  %1145 = vmatpush.msra.mxu0 %v338_v32  ;;  %v306_v3 = vld [vmem:[#allocation2 + $0xb0] sm:$0xff] }
  0xe9   : > { %1203 = vmatpush.msra.mxu3 %v538_v31  ;;  %1165 = vmatpush.msra.mxu1 %v402_v33  ;;  %v370_v4 = vld [vmem:[#allocation2 + $0x2b0] sm:$0xff] }
  0xea   : > { %1185 = vmatpush.msra.mxu2 %v466_v34  ;;  %1146 = vmatpush.msra.mxu0 %v334_v36  ;;  %v434_v5 = vld [vmem:[#allocation2 + $0x4b0] sm:$0xff] }
  0xeb   : > { %1204 = vmatpush.msra.mxu3 %v534_v35  ;;  %1166 = vmatpush.msra.mxu1 %v398_v37  ;;  %v502_v6 = vld [vmem:[#allocation2 + $0x6d0] sm:$0xff] }
  0xec   : > { %1186 = vmatpush.msra.mxu2 %v462_v38  ;;  %1147 = vmatpush.msra.mxu0 %v330_v40  ;;  %v302_v8 = vld [vmem:[#allocation2 + $0x90] sm:$0xff] }
  0xed   : > { %1205 = vmatpush.msra.mxu3 %v530_v39  ;;  %1119 = vmatmul.f32.vlgmr.msrb.gmra.mxu2 %v2202_v20  ;;  %v366_v9 = vld [vmem:[#allocation2 + $0x290] sm:$0xff] }
  0xee   : > { %1167 = vmatpush.msra.mxu1 %v394_v41  ;;  %1187 = vmatpush.msra.mxu2 %v458_v42  ;;  %v430_v10 = vld [vmem:[#allocation2 + $0x490] sm:$0xff] }
  0xef   : > { %1206 = vmatpush.msra.mxu3 %v526_v43  ;;  %1148 = vmatpush.msra.mxu0 %v326_v44  ;;  %v498_v11 = vld [vmem:[#allocation2 + $0x6b0] sm:$0xff] }
  0xf0   : > { %1139 = vmatmul.f32.vlgmr.msrb.gmra.mxu3 %v2208_v26  ;;  %1168 = vmatpush.msra.mxu1 %v390_v45  ;;  %v298_v12 = vld [vmem:[#allocation2 + $0x70] sm:$0xff] }
  0xf1   : > { %1188 = vmatpush.msra.mxu2 %v454_v46  ;;  %1207 = vmatpush.msra.mxu3 %v522_v47  ;;  %v362_v13 = vld [vmem:[#allocation2 + $0x270] sm:$0xff] }
  0xf2   : > { %1099 = vmatmul.f32.vlgmr.msrb.gmra.mxu1 %v2212_v30  ;;  %1149 = vmatpush.msra.mxu0 %v322_v48  ;;  %v426_v14 = vld [vmem:[#allocation2 + $0x470] sm:$0xff] }
  0xf3   : > { %1169 = vmatpush.msra.mxu1 %v386_v49  ;;  %1189 = vmatpush.msra.mxu2 %v450_v50  ;;  %v494_v15 = vld [vmem:[#allocation2 + $0x690] sm:$0xff] }
  0xf4   : > { %1208 = vmatpush.msra.mxu3 %v518_v51  ;;  %1150 = vmatpush.msra.mxu0 %v318_v52  ;;  %v294_v16 = vld [vmem:[#allocation2 + $0x50] sm:$0xff] }
  0xf5   : > { %1170 = vmatpush.msra.mxu1 %v382_v53  ;;  %1190 = vmatpush.msra.mxu2 %v446_v54  ;;  %v358_v17 = vld [vmem:[#allocation2 + $0x250] sm:$0xff] }
  0xf6   : > { %1209 = vmatpush.msra.mxu3 %v514_v55  ;;  %1151 = vmatpush.msra.mxu0 %v314_v56  ;;  %v422_v18 = vld [vmem:[#allocation2 + $0x450] sm:$0xff] }
  0xf7   : > { %1171 = vmatpush.msra.mxu1 %v378_v57  ;;  %1191 = vmatpush.msra.mxu2 %v442_v58  ;;  %v490_v19 = vld [vmem:[#allocation2 + $0x670] sm:$0xff] }
  0xf8   : > { %1210 = vmatpush.msra.mxu3 %v510_v59  ;;  %1152 = vmatpush.msra.mxu0 %v310_v60  ;;  %v290_v21 = vld [vmem:[#allocation2 + $0x30] sm:$0xff] }
  0xf9   : > { %1172 = vmatpush.msra.mxu1 %v374_v61  ;;  %1192 = vmatpush.msra.mxu2 %v438_v62  ;;  %v354_v22 = vld [vmem:[#allocation2 + $0x230] sm:$0xff] }
  0xfa   : > { %1211 = vmatpush.msra.mxu3 %v506_v63  ;;  %1153 = vmatpush.msra.mxu0 %v306_v3  ;;  %v418_v23 = vld [vmem:[#allocation2 + $0x430] sm:$0xff] }
  0xfb   : > { %1173 = vmatpush.msra.mxu1 %v370_v4  ;;  %1193 = vmatpush.msra.mxu2 %v434_v5  ;;  %v486_v25 = vld [vmem:[#allocation2 + $0x650] sm:$0xff] }
  0xfc   : > { %1212 = vmatpush.msra.mxu3 %v502_v6  ;;  %1154 = vmatpush.msra.mxu0 %v302_v8  ;;  %v286_v27 = vld [vmem:[#allocation2 + $0x10] sm:$0xff] }
  0xfd   : > { %1174 = vmatpush.msra.mxu1 %v366_v9  ;;  %1194 = vmatpush.msra.mxu2 %v430_v10  ;;  %v350_v28 = vld [vmem:[#allocation2 + $0x210] sm:$0xff] }
  0xfe   : > { %1213 = vmatpush.msra.mxu3 %v498_v11  ;;  %1155 = vmatpush.msra.mxu0 %v298_v12  ;;  %v414_v29 = vld [vmem:[#allocation2 + $0x410] sm:$0xff] }
  0xff   : > { %1175 = vmatpush.msra.mxu1 %v362_v13  ;;  %1195 = vmatpush.msra.mxu2 %v426_v14  ;;  %v482_v31 = vld [vmem:[#allocation2 + $0x630] sm:$0xff] }
 0x100   : > { %1214 = vmatpush.msra.mxu3 %v494_v15  ;;  %1156 = vmatpush.msra.mxu0 %v294_v16  ;;  %v602_v32 = vld [vmem:[#allocation2 + $0x9f0] sm:$0xff] }
 0x101   : > { %1176 = vmatpush.msra.mxu1 %v358_v17  ;;  %1196 = vmatpush.msra.mxu2 %v422_v18  ;;  %v666_v33 = vld [vmem:[#allocation2 + $0xbf0] sm:$0xff] }
 0x102   : > { %1215 = vmatpush.msra.mxu3 %v490_v19  ;;  %1157 = vmatpush.msra.mxu0 %v290_v21  ;;  %v730_v34 = vld [vmem:[#allocation2 + $0xdf0] sm:$0xff] }
 0x103   : > { %1177 = vmatpush.msra.mxu1 %v354_v22  ;;  %1197 = vmatpush.msra.mxu2 %v418_v23  ;;  %v478_v35 = vld [vmem:[#allocation2 + $0x610] sm:$0xff] }
 0x104   : > { %1216 = vmatpush.msra.mxu3 %v486_v25  ;;  %1158 = vmatpush.msra.mxu0 %v286_v27  ;;  %v598_v36 = vld [vmem:[#allocation2 + $0x9d0] sm:$0xff] }
 0x105   : > { %1178 = vmatpush.msra.mxu1 %v350_v28  ;;  %1198 = vmatpush.msra.mxu2 %v414_v29  ;;  %v662_v37 = vld [vmem:[#allocation2 + $0xbd0] sm:$0xff] }
 0x106   : > { %1217 = vmatpush.msra.mxu3 %v482_v31  ;;  %1223 = vmatpush.msrb.mxu0 %v602_v32  ;;  %v726_v38 = vld [vmem:[#allocation2 + $0xdd0] sm:$0xff] }
 0x107   : > { %1243 = vmatpush.msrb.mxu1 %v666_v33  ;;  %v794_v39 = vld [vmem:[#allocation2 + $0xff0] sm:$0xff]  ;;  %1263 = vmatpush.msrb.mxu2 %v730_v34 }
 0x108   : > { %1218 = vmatpush.msra.mxu3 %v478_v35  ;;  %v594_v40 = vld [vmem:[#allocation2 + $0x9b0] sm:$0xff]  ;;  %1224 = vmatpush.msrb.mxu0 %v598_v36 }
 0x109   : > { %v658_v41 = vld [vmem:[#allocation2 + $0xbb0] sm:$0xff]  ;;  %1244 = vmatpush.msrb.mxu1 %v662_v37  ;;  %1264 = vmatpush.msrb.mxu2 %v726_v38 }
 0x10a   : > { %v722_v42 = vld [vmem:[#allocation2 + $0xdb0] sm:$0xff]  ;;  %1283 = vmatpush.msrb.mxu3 %v794_v39  ;;  %1225 = vmatpush.msrb.mxu0 %v594_v40  ;;  %v347_v40 = vld [vmem:[#allocation2 + $0x1f8] sm:$0xff] }
 0x10b   : > { %v790_v43 = vld [vmem:[#allocation2 + $0xfd0] sm:$0xff]  ;;  %1245 = vmatpush.msrb.mxu1 %v658_v41  ;;  %1265 = vmatpush.msrb.mxu2 %v722_v42  ;;  %v411_v41 = vld [vmem:[#allocation2 + $0x3f8] sm:$0xff] }
 0x10c   : > { %v590_v44 = vld [vmem:[#allocation2 + $0x990] sm:$0xff]  ;;  %1284 = vmatpush.msrb.mxu3 %v790_v43  ;;  %1199 = vmatmul.f32.vlgmr.msra.gmra.mxu2 %v2192_v2  ;;  %v475_v42 = vld [vmem:[#allocation2 + $0x5f8] sm:$0xff] }
 0x10d   : > { %v654_v45 = vld [vmem:[#allocation2 + $0xb90] sm:$0xff]  ;;  %1226 = vmatpush.msrb.mxu0 %v590_v44  ;;  %1219 = vmatmul.f32.vlgmr.msra.gmra.mxu3 %v2197_v7  ;;  %v343_v44 = vld [vmem:[#allocation2 + $0x1d8] sm:$0xff] }
 0x10e   : > { %v718_v46 = vld [vmem:[#allocation2 + $0xd90] sm:$0xff]  ;;  %1246 = vmatpush.msrb.mxu1 %v654_v45  ;;  %1159 = vmatmul.f32.vlgmr.msra.gmra.mxu0 %v2186_v0  ;;  %v407_v45 = vld [vmem:[#allocation2 + $0x3d8] sm:$0xff] }
 0x10f   : > { %v786_v47 = vld [vmem:[#allocation2 + $0xfb0] sm:$0xff]  ;;  %1266 = vmatpush.msrb.mxu2 %v718_v46  ;;  %1179 = vmatmul.f32.vlgmr.msra.gmra.mxu1 %v2189_v1  ;;  %v471_v46 = vld [vmem:[#allocation2 + $0x5d8] sm:$0xff] }
 0x110   : > { %v586_v48 = vld [vmem:[#allocation2 + $0x970] sm:$0xff]  ;;  %1285 = vmatpush.msrb.mxu3 %v786_v47  ;;  %v539_v47 = vld [vmem:[#allocation2 + $0x7f8] sm:$0xff] }
 0x111   : > { %v650_v49 = vld [vmem:[#allocation2 + $0xb70] sm:$0xff]  ;;  %1227 = vmatpush.msrb.mxu0 %v586_v48  ;;  %v339_v48 = vld [vmem:[#allocation2 + $0x1b8] sm:$0xff] }
 0x112   : > { %v714_v50 = vld [vmem:[#allocation2 + $0xd70] sm:$0xff]  ;;  %1247 = vmatpush.msrb.mxu1 %v650_v49  ;;  %v403_v49 = vld [vmem:[#allocation2 + $0x3b8] sm:$0xff] }
 0x113   : > { %v782_v51 = vld [vmem:[#allocation2 + $0xf90] sm:$0xff]  ;;  %1267 = vmatpush.msrb.mxu2 %v714_v50  ;;  %v467_v50 = vld [vmem:[#allocation2 + $0x5b8] sm:$0xff] }
 0x114   : > { %v582_v52 = vld [vmem:[#allocation2 + $0x950] sm:$0xff]  ;;  %1286 = vmatpush.msrb.mxu3 %v782_v51  ;;  %v535_v51 = vld [vmem:[#allocation2 + $0x7d8] sm:$0xff] }
 0x115   : > { %v646_v53 = vld [vmem:[#allocation2 + $0xb50] sm:$0xff]  ;;  %1228 = vmatpush.msrb.mxu0 %v582_v52  ;;  %v335_v52 = vld [vmem:[#allocation2 + $0x198] sm:$0xff] }
 0x116   : > { %v710_v54 = vld [vmem:[#allocation2 + $0xd50] sm:$0xff]  ;;  %1248 = vmatpush.msrb.mxu1 %v646_v53  ;;  %v399_v53 = vld [vmem:[#allocation2 + $0x398] sm:$0xff] }
 0x117   : > { %v778_v55 = vld [vmem:[#allocation2 + $0xf70] sm:$0xff]  ;;  %1268 = vmatpush.msrb.mxu2 %v710_v54  ;;  %v463_v54 = vld [vmem:[#allocation2 + $0x598] sm:$0xff] }
 0x118   : > { %v578_v56 = vld [vmem:[#allocation2 + $0x930] sm:$0xff]  ;;  %1287 = vmatpush.msrb.mxu3 %v778_v55  ;;  %v531_v55 = vld [vmem:[#allocation2 + $0x7b8] sm:$0xff] }
 0x119   : > { %v642_v57 = vld [vmem:[#allocation2 + $0xb30] sm:$0xff]  ;;  %1229 = vmatpush.msrb.mxu0 %v578_v56  ;;  %v331_v56 = vld [vmem:[#allocation2 + $0x178] sm:$0xff] }
 0x11a   : > { %v706_v58 = vld [vmem:[#allocation2 + $0xd30] sm:$0xff]  ;;  %1249 = vmatpush.msrb.mxu1 %v642_v57  ;;  %v395_v57 = vld [vmem:[#allocation2 + $0x378] sm:$0xff] }
 0x11b   : > { %v774_v59 = vld [vmem:[#allocation2 + $0xf50] sm:$0xff]  ;;  %1269 = vmatpush.msrb.mxu2 %v706_v58  ;;  %v459_v58 = vld [vmem:[#allocation2 + $0x578] sm:$0xff] }
 0x11c   : > { %v574_v60 = vld [vmem:[#allocation2 + $0x910] sm:$0xff]  ;;  %1288 = vmatpush.msrb.mxu3 %v774_v59  ;;  %v527_v59 = vld [vmem:[#allocation2 + $0x798] sm:$0xff] }
 0x11d   : > { %v638_v61 = vld [vmem:[#allocation2 + $0xb10] sm:$0xff]  ;;  %1230 = vmatpush.msrb.mxu0 %v574_v60  ;;  %v327_v60 = vld [vmem:[#allocation2 + $0x158] sm:$0xff] }
 0x11e   : > { %v702_v62 = vld [vmem:[#allocation2 + $0xd10] sm:$0xff]  ;;  %1250 = vmatpush.msrb.mxu1 %v638_v61  ;;  %v391_v61 = vld [vmem:[#allocation2 + $0x358] sm:$0xff] }
 0x11f   : > { %v770_v63 = vld [vmem:[#allocation2 + $0xf30] sm:$0xff]  ;;  %1270 = vmatpush.msrb.mxu2 %v702_v62  ;;  %v455_v62 = vld [vmem:[#allocation2 + $0x558] sm:$0xff] }
 0x120   : > { %v570_v3 = vld [vmem:[#allocation2 + $0x8f0] sm:$0xff]  ;;  %1289 = vmatpush.msrb.mxu3 %v770_v63  ;;  %v523_v63 = vld [vmem:[#allocation2 + $0x778] sm:$0xff] }
 0x121   : > { %v634_v4 = vld [vmem:[#allocation2 + $0xaf0] sm:$0xff]  ;;  %1231 = vmatpush.msrb.mxu0 %v570_v3  ;;  %v323_v3 = vld [vmem:[#allocation2 + $0x138] sm:$0xff] }
 0x122   : > { %v698_v5 = vld [vmem:[#allocation2 + $0xcf0] sm:$0xff]  ;;  %1251 = vmatpush.msrb.mxu1 %v634_v4  ;;  %v387_v4 = vld [vmem:[#allocation2 + $0x338] sm:$0xff] }
 0x123   : > { %v766_v6 = vld [vmem:[#allocation2 + $0xf10] sm:$0xff]  ;;  %1271 = vmatpush.msrb.mxu2 %v698_v5  ;;  %v451_v5 = vld [vmem:[#allocation2 + $0x538] sm:$0xff] }
 0x124   : > { %v566_v8 = vld [vmem:[#allocation2 + $0x8d0] sm:$0xff]  ;;  %1290 = vmatpush.msrb.mxu3 %v766_v6  ;;  %v519_v6 = vld [vmem:[#allocation2 + $0x758] sm:$0xff] }
 0x125   : > { %v630_v9 = vld [vmem:[#allocation2 + $0xad0] sm:$0xff]  ;;  %1232 = vmatpush.msrb.mxu0 %v566_v8  ;;  %v319_v8 = vld [vmem:[#allocation2 + $0x118] sm:$0xff] }
 0x126   : > { %v694_v10 = vld [vmem:[#allocation2 + $0xcd0] sm:$0xff]  ;;  %1252 = vmatpush.msrb.mxu1 %v630_v9  ;;  %v383_v9 = vld [vmem:[#allocation2 + $0x318] sm:$0xff] }
 0x127   : > { %v762_v11 = vld [vmem:[#allocation2 + $0xef0] sm:$0xff]  ;;  %1272 = vmatpush.msrb.mxu2 %v694_v10  ;;  %v447_v10 = vld [vmem:[#allocation2 + $0x518] sm:$0xff] }
 0x128   : > { %v562_v12 = vld [vmem:[#allocation2 + $0x8b0] sm:$0xff]  ;;  %1291 = vmatpush.msrb.mxu3 %v762_v11  ;;  %v515_v11 = vld [vmem:[#allocation2 + $0x738] sm:$0xff] }
 0x129   : > { %v626_v13 = vld [vmem:[#allocation2 + $0xab0] sm:$0xff]  ;;  %1233 = vmatpush.msrb.mxu0 %v562_v12  ;;  %v315_v12 = vld [vmem:[#allocation2 + $0xf8] sm:$0xff] }
 0x12a   : > { %v690_v14 = vld [vmem:[#allocation2 + $0xcb0] sm:$0xff]  ;;  %1253 = vmatpush.msrb.mxu1 %v626_v13  ;;  %v379_v13 = vld [vmem:[#allocation2 + $0x2f8] sm:$0xff] }
 0x12b   : > { %v758_v15 = vld [vmem:[#allocation2 + $0xed0] sm:$0xff]  ;;  %1273 = vmatpush.msrb.mxu2 %v690_v14  ;;  %v443_v14 = vld [vmem:[#allocation2 + $0x4f8] sm:$0xff] }
 0x12c   : > { %v558_v16 = vld [vmem:[#allocation2 + $0x890] sm:$0xff]  ;;  %1292 = vmatpush.msrb.mxu3 %v758_v15  ;;  %v511_v15 = vld [vmem:[#allocation2 + $0x718] sm:$0xff] }
 0x12d   : > { %v622_v17 = vld [vmem:[#allocation2 + $0xa90] sm:$0xff]  ;;  %1234 = vmatpush.msrb.mxu0 %v558_v16  ;;  %v311_v16 = vld [vmem:[#allocation2 + $0xd8] sm:$0xff] }
 0x12e   : > { %v686_v18 = vld [vmem:[#allocation2 + $0xc90] sm:$0xff]  ;;  %1254 = vmatpush.msrb.mxu1 %v622_v17  ;;  %v375_v17 = vld [vmem:[#allocation2 + $0x2d8] sm:$0xff] }
 0x12f   : > { %v754_v19 = vld [vmem:[#allocation2 + $0xeb0] sm:$0xff]  ;;  %1274 = vmatpush.msrb.mxu2 %v686_v18  ;;  %v439_v18 = vld [vmem:[#allocation2 + $0x4d8] sm:$0xff] }
 0x130   : > { %v554_v21 = vld [vmem:[#allocation2 + $0x870] sm:$0xff]  ;;  %1293 = vmatpush.msrb.mxu3 %v754_v19  ;;  %v507_v19 = vld [vmem:[#allocation2 + $0x6f8] sm:$0xff] }
 0x131   : > { %v618_v22 = vld [vmem:[#allocation2 + $0xa70] sm:$0xff]  ;;  %1235 = vmatpush.msrb.mxu0 %v554_v21  ;;  %v307_v21 = vld [vmem:[#allocation2 + $0xb8] sm:$0xff] }
 0x132   : > { %v682_v23 = vld [vmem:[#allocation2 + $0xc70] sm:$0xff]  ;;  %1255 = vmatpush.msrb.mxu1 %v618_v22  ;;  %v371_v22 = vld [vmem:[#allocation2 + $0x2b8] sm:$0xff] }
 0x133   : > { %v750_v25 = vld [vmem:[#allocation2 + $0xe90] sm:$0xff]  ;;  %1275 = vmatpush.msrb.mxu2 %v682_v23  ;;  %v435_v23 = vld [vmem:[#allocation2 + $0x4b8] sm:$0xff] }
 0x134   : > { %v550_v27 = vld [vmem:[#allocation2 + $0x850] sm:$0xff]  ;;  %1294 = vmatpush.msrb.mxu3 %v750_v25  ;;  %v503_v25 = vld [vmem:[#allocation2 + $0x6d8] sm:$0xff] }
 0x135   : > { %v614_v28 = vld [vmem:[#allocation2 + $0xa50] sm:$0xff]  ;;  %1236 = vmatpush.msrb.mxu0 %v550_v27  ;;  %v303_v27 = vld [vmem:[#allocation2 + $0x98] sm:$0xff] }
 0x136   : > { %v678_v29 = vld [vmem:[#allocation2 + $0xc50] sm:$0xff]  ;;  %1256 = vmatpush.msrb.mxu1 %v614_v28  ;;  %v367_v28 = vld [vmem:[#allocation2 + $0x298] sm:$0xff] }
 0x137   : > { %v746_v31 = vld [vmem:[#allocation2 + $0xe70] sm:$0xff]  ;;  %1276 = vmatpush.msrb.mxu2 %v678_v29  ;;  %v431_v29 = vld [vmem:[#allocation2 + $0x498] sm:$0xff] }
 0x138   : > { %v546_v32 = vld [vmem:[#allocation2 + $0x830] sm:$0xff]  ;;  %1295 = vmatpush.msrb.mxu3 %v746_v31  ;;  %v499_v31 = vld [vmem:[#allocation2 + $0x6b8] sm:$0xff] }
 0x139   : > { %v610_v33 = vld [vmem:[#allocation2 + $0xa30] sm:$0xff]  ;;  %1237 = vmatpush.msrb.mxu0 %v546_v32  ;;  %v299_v32 = vld [vmem:[#allocation2 + $0x78] sm:$0xff] }
 0x13a   : > { %v674_v34 = vld [vmem:[#allocation2 + $0xc30] sm:$0xff]  ;;  %1257 = vmatpush.msrb.mxu1 %v610_v33  ;;  %v363_v33 = vld [vmem:[#allocation2 + $0x278] sm:$0xff] }
 0x13b   : > { %v742_v35 = vld [vmem:[#allocation2 + $0xe50] sm:$0xff]  ;;  %1277 = vmatpush.msrb.mxu2 %v674_v34  ;;  %v427_v34 = vld [vmem:[#allocation2 + $0x478] sm:$0xff] }
 0x13c   : > { %v542_v36 = vld [vmem:[#allocation2 + $0x810] sm:$0xff]  ;;  %1296 = vmatpush.msrb.mxu3 %v742_v35  ;;  %v495_v35 = vld [vmem:[#allocation2 + $0x698] sm:$0xff] }
 0x13d   : > { %v606_v37 = vld [vmem:[#allocation2 + $0xa10] sm:$0xff]  ;;  %1238 = vmatpush.msrb.mxu0 %v542_v36  ;;  %v295_v36 = vld [vmem:[#allocation2 + $0x58] sm:$0xff] }
 0x13e   : > { %v670_v38 = vld [vmem:[#allocation2 + $0xc10] sm:$0xff]  ;;  %1258 = vmatpush.msrb.mxu1 %v606_v37  ;;  %1239 = vmatmul.f32.vlgmr.msrb.gmra.mxu0 %v2205_v24  ;;  %v359_v37 = vld [vmem:[#allocation2 + $0x258] sm:$0xff] }
 0x13f   : > { %v738_v39 = vld [vmem:[#allocation2 + $0xe30] sm:$0xff]  ;;  %1278 = vmatpush.msrb.mxu2 %v670_v38  ;;  %1303 = vmatpush.msra.mxu0 %v347_v40  ;;  %v423_v38 = vld [vmem:[#allocation2 + $0x458] sm:$0xff] }
 0x140   : > { %1297 = vmatpush.msrb.mxu3 %v738_v39  ;;  %v734_v43 = vld [vmem:[#allocation2 + $0xe10] sm:$0xff]  ;;  %1279 = vmatmul.f32.vlgmr.msrb.gmra.mxu2 %v2202_v20  ;;  %v491_v39 = vld [vmem:[#allocation2 + $0x678] sm:$0xff] }
 0x141   : > { %1323 = vmatpush.msra.mxu1 %v411_v41  ;;  %1343 = vmatpush.msra.mxu2 %v475_v42  ;;  %v291_v40 = vld [vmem:[#allocation2 + $0x38] sm:$0xff] }
 0x142   : > { %1298 = vmatpush.msrb.mxu3 %v734_v43  ;;  %1304 = vmatpush.msra.mxu0 %v343_v44  ;;  %v355_v41 = vld [vmem:[#allocation2 + $0x238] sm:$0xff] }
 0x143   : > { %1299 = vmatmul.f32.vlgmr.msrb.gmra.mxu3 %v2208_v26  ;;  %1324 = vmatpush.msra.mxu1 %v407_v45  ;;  %v419_v42 = vld [vmem:[#allocation2 + $0x438] sm:$0xff] }
 0x144   : > { %1344 = vmatpush.msra.mxu2 %v471_v46  ;;  %1363 = vmatpush.msra.mxu3 %v539_v47  ;;  %v487_v43 = vld [vmem:[#allocation2 + $0x658] sm:$0xff] }
 0x145   : > { %1259 = vmatmul.f32.vlgmr.msrb.gmra.mxu1 %v2212_v30  ;;  %1305 = vmatpush.msra.mxu0 %v339_v48  ;;  %v287_v44 = vld [vmem:[#allocation2 + $0x18] sm:$0xff] }
 0x146   : > { %1325 = vmatpush.msra.mxu1 %v403_v49  ;;  %1345 = vmatpush.msra.mxu2 %v467_v50  ;;  %v351_v45 = vld [vmem:[#allocation2 + $0x218] sm:$0xff] }
 0x147   : > { %1364 = vmatpush.msra.mxu3 %v535_v51  ;;  %1306 = vmatpush.msra.mxu0 %v335_v52  ;;  %v415_v46 = vld [vmem:[#allocation2 + $0x418] sm:$0xff] }
 0x148   : > { %1326 = vmatpush.msra.mxu1 %v399_v53  ;;  %1346 = vmatpush.msra.mxu2 %v463_v54  ;;  %v483_v47 = vld [vmem:[#allocation2 + $0x638] sm:$0xff] }
 0x149   : > { %1365 = vmatpush.msra.mxu3 %v531_v55  ;;  %1307 = vmatpush.msra.mxu0 %v331_v56  ;;  %v603_v48 = vld [vmem:[#allocation2 + $0x9f8] sm:$0xff] }
 0x14a   : > { %1327 = vmatpush.msra.mxu1 %v395_v57  ;;  %1347 = vmatpush.msra.mxu2 %v459_v58  ;;  %v667_v49 = vld [vmem:[#allocation2 + $0xbf8] sm:$0xff] }
 0x14b   : > { %1366 = vmatpush.msra.mxu3 %v527_v59  ;;  %1308 = vmatpush.msra.mxu0 %v327_v60  ;;  %v731_v50 = vld [vmem:[#allocation2 + $0xdf8] sm:$0xff] }
 0x14c   : > { %1328 = vmatpush.msra.mxu1 %v391_v61  ;;  %1348 = vmatpush.msra.mxu2 %v455_v62  ;;  %v479_v51 = vld [vmem:[#allocation2 + $0x618] sm:$0xff] }
 0x14d   : > { %1367 = vmatpush.msra.mxu3 %v523_v63  ;;  %1309 = vmatpush.msra.mxu0 %v323_v3  ;;  %v599_v52 = vld [vmem:[#allocation2 + $0x9d8] sm:$0xff] }
 0x14e   : > { %1329 = vmatpush.msra.mxu1 %v387_v4  ;;  %1349 = vmatpush.msra.mxu2 %v451_v5  ;;  %v663_v53 = vld [vmem:[#allocation2 + $0xbd8] sm:$0xff] }
 0x14f   : > { %1368 = vmatpush.msra.mxu3 %v519_v6  ;;  %1310 = vmatpush.msra.mxu0 %v319_v8  ;;  %v727_v54 = vld [vmem:[#allocation2 + $0xdd8] sm:$0xff] }
 0x150   : > { %1330 = vmatpush.msra.mxu1 %v383_v9  ;;  %1350 = vmatpush.msra.mxu2 %v447_v10  ;;  %v795_v55 = vld [vmem:[#allocation2 + $0xff8] sm:$0xff] }
 0x151   : > { %1369 = vmatpush.msra.mxu3 %v515_v11  ;;  %1311 = vmatpush.msra.mxu0 %v315_v12  ;;  %v595_v56 = vld [vmem:[#allocation2 + $0x9b8] sm:$0xff] }
 0x152   : > { %1331 = vmatpush.msra.mxu1 %v379_v13  ;;  %1351 = vmatpush.msra.mxu2 %v443_v14  ;;  %v659_v57 = vld [vmem:[#allocation2 + $0xbb8] sm:$0xff] }
 0x153   : > { %1370 = vmatpush.msra.mxu3 %v511_v15  ;;  %1312 = vmatpush.msra.mxu0 %v311_v16  ;;  %v723_v58 = vld [vmem:[#allocation2 + $0xdb8] sm:$0xff]  ;;  %v2233_v16 = vpop.f32.mrf.mxu0 }
 0x154   : > { %1332 = vmatpush.msra.mxu1 %v375_v17  ;;  %1352 = vmatpush.msra.mxu2 %v439_v18  ;;  %v791_v59 = vld [vmem:[#allocation2 + $0xfd8] sm:$0xff] }
 0x155   : > { %1371 = vmatpush.msra.mxu3 %v507_v19  ;;  %1313 = vmatpush.msra.mxu0 %v307_v21  ;;  %v591_v60 = vld [vmem:[#allocation2 + $0x998] sm:$0xff] }
 0x156   : > { %1333 = vmatpush.msra.mxu1 %v371_v22  ;;  %1353 = vmatpush.msra.mxu2 %v435_v23  ;;  %v655_v61 = vld [vmem:[#allocation2 + $0xb98] sm:$0xff] }
 0x157   : > { %1372 = vmatpush.msra.mxu3 %v503_v25  ;;  %1314 = vmatpush.msra.mxu0 %v303_v27  ;;  %v719_v62 = vld [vmem:[#allocation2 + $0xd98] sm:$0xff] }
 0x158   : > { %1334 = vmatpush.msra.mxu1 %v367_v28  ;;  %1354 = vmatpush.msra.mxu2 %v431_v29  ;;  %v787_v63 = vld [vmem:[#allocation2 + $0xfb8] sm:$0xff]  ;;  %v2235_v28 = vpop.f32.mrf.mxu1 }
 0x159   : > { %1373 = vmatpush.msra.mxu3 %v499_v31  ;;  %1315 = vmatpush.msra.mxu0 %v299_v32  ;;  %v587_v3 = vld [vmem:[#allocation2 + $0x978] sm:$0xff] }
 0x15a   : > { %1335 = vmatpush.msra.mxu1 %v363_v33  ;;  %1355 = vmatpush.msra.mxu2 %v427_v34  ;;  %v651_v4 = vld [vmem:[#allocation2 + $0xb78] sm:$0xff] }
 0x15b   : > { %1374 = vmatpush.msra.mxu3 %v495_v35  ;;  %1316 = vmatpush.msra.mxu0 %v295_v36  ;;  %v715_v5 = vld [vmem:[#allocation2 + $0xd78] sm:$0xff] }
 0x15c   : > { %1336 = vmatpush.msra.mxu1 %v359_v37  ;;  %1356 = vmatpush.msra.mxu2 %v423_v38  ;;  %v783_v6 = vld [vmem:[#allocation2 + $0xf98] sm:$0xff]  ;;  %v2237_v38 = vpop.f32.mrf.mxu2 }
 0x15d   : > { %1375 = vmatpush.msra.mxu3 %v491_v39  ;;  %1317 = vmatpush.msra.mxu0 %v291_v40  ;;  %v583_v8 = vld [vmem:[#allocation2 + $0x958] sm:$0xff] }
 0x15e   : > { %1337 = vmatpush.msra.mxu1 %v355_v41  ;;  %1357 = vmatpush.msra.mxu2 %v419_v42  ;;  %v647_v9 = vld [vmem:[#allocation2 + $0xb58] sm:$0xff] }
 0x15f   : > { %1376 = vmatpush.msra.mxu3 %v487_v43  ;;  %1318 = vmatpush.msra.mxu0 %v287_v44  ;;  %v711_v10 = vld [vmem:[#allocation2 + $0xd58] sm:$0xff]  ;;  %v2239_v43 = vpop.f32.mrf.mxu0 }
 0x160   : > { %1338 = vmatpush.msra.mxu1 %v351_v45  ;;  %1358 = vmatpush.msra.mxu2 %v415_v46  ;;  %v779_v11 = vld [vmem:[#allocation2 + $0xf78] sm:$0xff] }
 0x161   : > { %1377 = vmatpush.msra.mxu3 %v483_v47  ;;  %1383 = vmatpush.msrb.mxu0 %v603_v48  ;;  %v579_v12 = vld [vmem:[#allocation2 + $0x938] sm:$0xff]  ;;  %v2241_v47 = vpop.f32.mrf.mxu3 }
 0x162   : > { %1403 = vmatpush.msrb.mxu1 %v667_v49  ;;  %1423 = vmatpush.msrb.mxu2 %v731_v50  ;;  %v643_v13 = vld [vmem:[#allocation2 + $0xb38] sm:$0xff]  ;;  %v2244_v50 = vld [vmem:[#allocation4] sm:$0xf] }
 0x163   : > { %1378 = vmatpush.msra.mxu3 %v479_v51  ;;  %1384 = vmatpush.msrb.mxu0 %v599_v52  ;;  %v707_v14 = vld [vmem:[#allocation2 + $0xd38] sm:$0xff]  ;;  %v2246_v51 = vpop.f32.mrf.mxu1 }
 0x164   : > { %1404 = vmatpush.msrb.mxu1 %v663_v53  ;;  %1424 = vmatpush.msrb.mxu2 %v727_v54  ;;  %v775_v15 = vld [vmem:[#allocation2 + $0xf58] sm:$0xff] }
 0x165   : > { %1443 = vmatpush.msrb.mxu3 %v795_v55  ;;  %1385 = vmatpush.msrb.mxu0 %v595_v56  ;;  %v575_v17 = vld [vmem:[#allocation2 + $0x918] sm:$0xff] }
 0x166   : > { %1405 = vmatpush.msrb.mxu1 %v659_v57  ;;  %1425 = vmatpush.msrb.mxu2 %v723_v58  ;;  %v639_v18 = vld [vmem:[#allocation2 + $0xb18] sm:$0xff] }
 0x167   : > { %1444 = vmatpush.msrb.mxu3 %v791_v59  ;;  %1386 = vmatpush.msrb.mxu0 %v591_v60  ;;  %v703_v19 = vld [vmem:[#allocation2 + $0xd18] sm:$0xff]  ;;  %v816_v59 = vperm.slane %v2244_v50, 1  ;;  %v2252_v60 = vpop.f32.mrf.mxu2 }
 0x168   : > { %1406 = vmatpush.msrb.mxu1 %v655_v61  ;;  %1426 = vmatpush.msrb.mxu2 %v719_v62  ;;  %v771_v21 = vld [vmem:[#allocation2 + $0xf38] sm:$0xff]  ;;  %v1000_v62 = vpop.f32.mrf.mxu0 }
 0x169   : > { %1445 = vmatpush.msrb.mxu3 %v787_v63  ;;  %1387 = vmatpush.msrb.mxu0 %v587_v3  ;;  %v571_v22 = vld [vmem:[#allocation2 + $0x8f8] sm:$0xff] }
 0x16a   : > { %1407 = vmatpush.msrb.mxu1 %v651_v4  ;;  %1427 = vmatpush.msrb.mxu2 %v715_v5  ;;  %v635_v23 = vld [vmem:[#allocation2 + $0xaf8] sm:$0xff] }
 0x16b   : > { %1446 = vmatpush.msrb.mxu3 %v783_v6  ;;  %1388 = vmatpush.msrb.mxu0 %v583_v8  ;;  %v699_v25 = vld [vmem:[#allocation2 + $0xcf8] sm:$0xff]  ;;  %v1001_v8 = vadd.f32 %v1000_v62, %v816_v59 }
 0x16c   : > { %1408 = vmatpush.msrb.mxu1 %v647_v9  ;;  %1428 = vmatpush.msrb.mxu2 %v711_v10  ;;  %v767_v27 = vld [vmem:[#allocation2 + $0xf18] sm:$0xff]  ;;  %v2256_v9 = vpop.f32.mrf.mxu3  ;;  %v1495_v10 = vld [vmem:[#allocation6 + $0xe0] sm:$0xff] }
 0x16d   : > { %1447 = vmatpush.msrb.mxu3 %v779_v11  ;;  %1389 = vmatpush.msrb.mxu0 %v579_v12  ;;  %v567_v29 = vld [vmem:[#allocation2 + $0x8d8] sm:$0xff]  ;;  %v1527_v11 = vld [vmem:[#allocation6 + $0x1e0] sm:$0xff] }
 0x16e   : > { %1409 = vmatpush.msrb.mxu1 %v643_v13  ;;  %1429 = vmatpush.msrb.mxu2 %v707_v14  ;;  %v631_v31 = vld [vmem:[#allocation2 + $0xad8] sm:$0xff] }
 0x16f   : > { %1448 = vmatpush.msrb.mxu3 %v775_v15  ;;  %1390 = vmatpush.msrb.mxu0 %v575_v17  ;;  %v695_v32 = vld [vmem:[#allocation2 + $0xcd8] sm:$0xff]  ;;  %v1040_v17 = vpop.f32.mrf.mxu2 }
 0x170   : > { %1410 = vmatpush.msrb.mxu1 %v639_v18  ;;  %1430 = vmatpush.msrb.mxu2 %v703_v19  ;;  %v763_v33 = vld [vmem:[#allocation2 + $0xef8] sm:$0xff]  ;;  %v1559_v18 = vld [vmem:[#allocation6 + $0x2e0] sm:$0xff] }
 0x171   : > { %1449 = vmatpush.msrb.mxu3 %v771_v21  ;;  %1391 = vmatpush.msrb.mxu0 %v571_v22  ;;  %v563_v34 = vld [vmem:[#allocation2 + $0x8b8] sm:$0xff]  ;;  %v1523_v19 = vld [vmem:[#allocation6 + $0x1c0] sm:$0xff] }
 0x172   : > { %1411 = vmatpush.msrb.mxu1 %v635_v23  ;;  %1431 = vmatpush.msrb.mxu2 %v699_v25  ;;  %v627_v35 = vld [vmem:[#allocation2 + $0xab8] sm:$0xff] }
 0x173   : > { %1450 = vmatpush.msrb.mxu3 %v767_v27  ;;  %1392 = vmatpush.msrb.mxu0 %v567_v29  ;;  %v691_v36 = vld [vmem:[#allocation2 + $0xcb8] sm:$0xff]  ;;  %v1555_v27 = vld [vmem:[#allocation6 + $0x2c0] sm:$0xff] }
 0x174   : > { %1412 = vmatpush.msrb.mxu1 %v631_v31  ;;  %v759_v37 = vld [vmem:[#allocation2 + $0xed8] sm:$0xff]  ;;  %1432 = vmatpush.msrb.mxu2 %v695_v32  ;;  %v1060_v25 = vpop.f32.mrf.mxu3  ;;  %v1519_v29 = vld [vmem:[#allocation6 + $0x1a0] sm:$0xff] }
 0x175   : > { %1451 = vmatpush.msrb.mxu3 %v763_v33  ;;  %v559_v39 = vld [vmem:[#allocation2 + $0x898] sm:$0xff]  ;;  %1393 = vmatpush.msrb.mxu0 %v563_v34 }
 0x176   : > { %v623_v40 = vld [vmem:[#allocation2 + $0xa98] sm:$0xff]  ;;  %1413 = vmatpush.msrb.mxu1 %v627_v35  ;;  %1433 = vmatpush.msrb.mxu2 %v691_v36  ;;  %v1080_v35 = vpop.f32.mrf.mxu0  ;;  %v1551_v36 = vld [vmem:[#allocation6 + $0x2a0] sm:$0xff] }
 0x177   : > { %v687_v41 = vld [vmem:[#allocation2 + $0xc98] sm:$0xff]  ;;  %1452 = vmatpush.msrb.mxu3 %v759_v37  ;;  %1394 = vmatpush.msrb.mxu0 %v559_v39  ;;  %v1483_v37 = vld [vmem:[#allocation6 + $0x80] sm:$0xff] }
 0x178   : > { %v755_v42 = vld [vmem:[#allocation2 + $0xeb8] sm:$0xff]  ;;  %1414 = vmatpush.msrb.mxu1 %v623_v40  ;;  %1434 = vmatpush.msrb.mxu2 %v687_v41 }
 0x179   : > { %v555_v44 = vld [vmem:[#allocation2 + $0x878] sm:$0xff]  ;;  %1453 = vmatpush.msrb.mxu3 %v755_v42  ;;  %1359 = vmatmul.f32.vlgmr.msra.gmra.mxu2 %v2192_v2  ;;  %v815_v2 = vperm.slane %v2244_v50, 0 }
 0x17a   : > { %v619_v45 = vld [vmem:[#allocation2 + $0xa78] sm:$0xff]  ;;  %1395 = vmatpush.msrb.mxu0 %v555_v44  ;;  %1379 = vmatmul.f32.vlgmr.msra.gmra.mxu3 %v2197_v7 }
 0x17b   : > { %v683_v46 = vld [vmem:[#allocation2 + $0xc78] sm:$0xff]  ;;  %1415 = vmatpush.msrb.mxu1 %v619_v45  ;;  %1319 = vmatmul.f32.vlgmr.msra.gmra.mxu0 %v2186_v0  ;;  %v841_v4 = vadd.f32 %v2233_v16, %v815_v2  ;;  %v1475_v2 = vld [vmem:[#allocation6 + $0x40] sm:$0xff] }
 0x17c   : > { %v751_v48 = vld [vmem:[#allocation2 + $0xe98] sm:$0xff]  ;;  %1435 = vmatpush.msrb.mxu2 %v683_v46  ;;  %1339 = vmatmul.f32.vlgmr.msra.gmra.mxu1 %v2189_v1  ;;  %v1020_v1 = vpop.f32.mrf.mxu1  ;;  %v1547_v46 = vld [vmem:[#allocation6 + $0x280] sm:$0xff] }
 0x17d   : > { %v551_v49 = vld [vmem:[#allocation2 + $0x858] sm:$0xff]  ;;  %1454 = vmatpush.msrb.mxu3 %v751_v48  ;;  %v861_v13 = vadd.f32 %v2235_v28, %v841_v4  ;;  %v1021_v16 = vadd.f32 %v1020_v1, %v1001_v8  ;;  %v1487_v28 = vld [vmem:[#allocation6 + $0xa0] sm:$0xff] }
 0x17e   : > { %v615_v52 = vld [vmem:[#allocation2 + $0xa58] sm:$0xff]  ;;  %1396 = vmatpush.msrb.mxu0 %v551_v49  ;;  %v1511_v48 = vld [vmem:[#allocation6 + $0x160] sm:$0xff] }
 0x17f   : > { %v679_v53 = vld [vmem:[#allocation2 + $0xc58] sm:$0xff]  ;;  %1416 = vmatpush.msrb.mxu1 %v615_v52  ;;  %v881_v22 = vadd.f32 %v2237_v38, %v861_v13  ;;  %v1515_v38 = vld [vmem:[#allocation6 + $0x180] sm:$0xff] }
 0x180   : > { %v747_v54 = vld [vmem:[#allocation2 + $0xe78] sm:$0xff]  ;;  %1436 = vmatpush.msrb.mxu2 %v679_v53  ;;  %v1535_v1 = vld [vmem:[#allocation6 + $0x220] sm:$0xff] }
 0x181   : > { %v547_v55 = vld [vmem:[#allocation2 + $0x838] sm:$0xff]  ;;  %1455 = vmatpush.msrb.mxu3 %v747_v54  ;;  %v901_v31 = vadd.f32 %v2241_v47, %v881_v22  ;;  %v1479_v47 = vld [vmem:[#allocation6 + $0x60] sm:$0xff]  ;;  %v1492_v22 = vld [vmem:[#allocation6 + $0xc8] sm:$0xff] }
 0x182   : > { %v611_v56 = vld [vmem:[#allocation2 + $0xa38] sm:$0xff]  ;;  %1397 = vmatpush.msrb.mxu0 %v547_v55 }
 0x183   : > { %v675_v57 = vld [vmem:[#allocation2 + $0xc38] sm:$0xff]  ;;  %1417 = vmatpush.msrb.mxu1 %v611_v56  ;;  %v921_v40 = vadd.f32 %v2239_v43, %v901_v31  ;;  %v1120_v43 = vpop.f32.mrf.mxu2  ;;  %v1543_v56 = vld [vmem:[#allocation6 + $0x260] sm:$0xff]  ;;  %v1556_v31 = vld [vmem:[#allocation6 + $0x2c8] sm:$0xff] }
 0x184   : > { %v743_v58 = vld [vmem:[#allocation2 + $0xe58] sm:$0xff]  ;;  %1437 = vmatpush.msrb.mxu2 %v675_v57  ;;  %v1100_v45 = vpop.f32.mrf.mxu1  ;;  %v1507_v57 = vld [vmem:[#allocation6 + $0x140] sm:$0xff] }
 0x185   : > { %v543_v0 = vld [vmem:[#allocation2 + $0x818] sm:$0xff]  ;;  %1456 = vmatpush.msrb.mxu3 %v743_v58  ;;  %v941_v52 = vadd.f32 %v2246_v51, %v921_v40  ;;  %v1140_v51 = vpop.f32.mrf.mxu3  ;;  %v817_v40 = vperm.slane %v2244_v50, 2 }
 0x186   : > { %v607_v61 = vld [vmem:[#allocation2 + $0xa18] sm:$0xff]  ;;  %1398 = vmatpush.msrb.mxu0 %v543_v0 }
 0x187   : > { %v671_v7 = vld [vmem:[#allocation2 + $0xc18] sm:$0xff]  ;;  %1418 = vmatpush.msrb.mxu1 %v607_v61  ;;  %1399 = vmatmul.f32.vlgmr.msrb.gmra.mxu0 %v2205_v24  ;;  %v1041_v24 = vadd.f32 %v1040_v17, %v1021_v16  ;;  %v961_v59 = vadd.f32 %v2252_v60, %v941_v52  ;;  %v1496_v16 = vld [vmem:[#allocation6 + $0xe8] sm:$0xff] }
 0x188   : > { %v739_v63 = vld [vmem:[#allocation2 + $0xe38] sm:$0xff]  ;;  %1438 = vmatpush.msrb.mxu2 %v671_v7  ;;  %1419 = vmatmul.f32.vlgmr.msrb.gmra.mxu1 %v2212_v30  ;;  %v1539_v7 = vld [vmem:[#allocation6 + $0x240] sm:$0xff]  ;;  %v1528_v17 = vld [vmem:[#allocation6 + $0x1e8] sm:$0xff] }
 0x189   : > { %v1497_v3 = vld [vmem:[#allocation6 + $0xf0] sm:$0xff]  ;;  %1457 = vmatpush.msrb.mxu3 %v739_v63  ;;  %1439 = vmatmul.f32.vlgmr.msrb.gmra.mxu2 %v2202_v20  ;;  %v1491_v20 = vld [vmem:[#allocation6 + $0xc0] sm:$0xff]  ;;  %v1061_v32 = vadd.f32 %v1060_v25, %v1041_v24  ;;  %v1524_v24 = vld [vmem:[#allocation6 + $0x1c8] sm:$0xff] }
 0x18a   : > { %v1529_v5 = vld [vmem:[#allocation6 + $0x1f0] sm:$0xff]  ;;  %1601 = vmatpush.msra.mxu0 %v1497_v3  ;;  %v1471_v63 = vld [vmem:[#allocation6 + $0x20] sm:$0xff]  ;;  %v1522_v25 = vld [vmem:[#allocation6 + $0x1b8] sm:$0xff] }
 0x18b   : > { %v735_v6 = vld [vmem:[#allocation2 + $0xe18] sm:$0xff]  ;;  %1621 = vmatpush.msra.mxu1 %v1529_v5  ;;  %v1081_v41 = vadd.f32 %v1080_v35, %v1061_v32  ;;  %v1503_v3 = vld [vmem:[#allocation6 + $0x120] sm:$0xff]  ;;  %v2269_v5 = vadd.f32 %v2256_v9, %v961_v59  ;;  %v1484_v35 = vld [vmem:[#allocation6 + $0x88] sm:$0xff] }
 0x18c   : > { %1458 = vmatpush.msrb.mxu3 %v735_v6  ;;  %v1561_v12 = vld [vmem:[#allocation6 + $0x2f0] sm:$0xff]  ;;  %1602 = vmatpush.msra.mxu0 %v1495_v10  ;;  %v1467_v10 = vld [vmem:[#allocation6] sm:$0xff]  ;;  %v1530_v9 = vld [vmem:[#allocation6 + $0x1f8] sm:$0xff] }
 0x18d   : > { %1459 = vmatmul.f32.vlgmr.msrb.gmra.mxu3 %v2208_v26  ;;  %v1493_v14 = vld [vmem:[#allocation6 + $0xd0] sm:$0xff]  ;;  %1622 = vmatpush.msra.mxu1 %v1527_v11  ;;  %v1101_v53 = vadd.f32 %v1100_v45, %v1081_v41  ;;  %v1499_v11 = vld [vmem:[#allocation6 + $0x100] sm:$0xff]  ;;  %v1486_v32 = vld [vmem:[#allocation6 + $0x98] sm:$0xff] }
 0x18e   : > { %v1525_v15 = vld [vmem:[#allocation6 + $0x1d0] sm:$0xff]  ;;  %1641 = vmatpush.msra.mxu2 %v1561_v12  ;;  %1603 = vmatpush.msra.mxu0 %v1493_v14  ;;  %v1463_v12 = vmax.f32 %v2269_v5, 0.0  ;;  %v1498_v14 = vld [vmem:[#allocation6 + $0xf8] sm:$0xff]  ;;  %v1480_v45 = vld [vmem:[#allocation6 + $0x68] sm:$0xff] }
 0x18f   : > { %1623 = vmatpush.msra.mxu1 %v1525_v15  ;;  %v1557_v21 = vld [vmem:[#allocation6 + $0x2d0] sm:$0xff]  ;;  %v1121_v0 = vadd.f32 %v1120_v43, %v1101_v53  ;;  %v1550_v41 = vld [vmem:[#allocation6 + $0x298] sm:$0xff]  ;;  %v1200_v59 = vpop.f32.mrf.mxu2  ;;  %v1567_v5 = vld [vmem:[#allocation6 + $0x320] sm:$0xff] }
 0x190   : > { %v1489_v23 = vld [vmem:[#allocation6 + $0xb0] sm:$0xff]  ;;  %1642 = vmatpush.msra.mxu2 %v1559_v18  ;;  %1604 = vmatpush.msra.mxu0 %v1491_v20  ;;  %v1531_v18 = vld [vmem:[#allocation6 + $0x200] sm:$0xff]  ;;  %v1494_v20 = vld [vmem:[#allocation6 + $0xd8] sm:$0xff] }
 0x191   : > { %v1521_v26 = vld [vmem:[#allocation6 + $0x1b0] sm:$0xff]  ;;  %1624 = vmatpush.msra.mxu1 %v1523_v19  ;;  %v2271_v6 = vadd.f32 %v1140_v51, %v1121_v0  ;;  %v1526_v19 = vld [vmem:[#allocation6 + $0x1d8] sm:$0xff]  ;;  %v1544_v0 = vld [vmem:[#allocation6 + $0x268] sm:$0xff] }
 0x192   : > { %1643 = vmatpush.msra.mxu2 %v1557_v21  ;;  %1605 = vmatpush.msra.mxu0 %v1489_v23  ;;  %v1553_v30 = vld [vmem:[#allocation6 + $0x2b0] sm:$0xff]  ;;  %v1562_v21 = vld [vmem:[#allocation6 + $0x2f8] sm:$0xff]  ;;  %v1560_v23 = vld [vmem:[#allocation6 + $0x2e8] sm:$0xff] }
 0x193   : > { %1625 = vmatpush.msra.mxu1 %v1521_v26  ;;  %v1485_v33 = vld [vmem:[#allocation6 + $0x90] sm:$0xff]  ;;  %v1464_v13 = vmax.f32 %v2271_v6, 0.0  ;;  %v1490_v26 = vld [vmem:[#allocation6 + $0xb8] sm:$0xff] }
 0x194   : > { %v1517_v34 = vld [vmem:[#allocation6 + $0x190] sm:$0xff]  ;;  %1644 = vmatpush.msra.mxu2 %v1555_v27  ;;  %1606 = vmatpush.msra.mxu0 %v1487_v28  ;;  %v1558_v27 = vld [vmem:[#allocation6 + $0x2d8] sm:$0xff]  ;;  %v1488_v28 = vld [vmem:[#allocation6 + $0xa8] sm:$0xff] }
 0x195   : > { %1626 = vmatpush.msra.mxu1 %v1519_v29  ;;  %v1549_v39 = vld [vmem:[#allocation6 + $0x290] sm:$0xff]  ;;  %v1520_v29 = vld [vmem:[#allocation6 + $0x1a8] sm:$0xff]  ;;  %v1478_v52 = vld [vmem:[#allocation6 + $0x58] sm:$0xff] }
 0x196   : > { %1645 = vmatpush.msra.mxu2 %v1553_v30  ;;  %1607 = vmatpush.msra.mxu0 %v1485_v33  ;;  %v1481_v42 = vld [vmem:[#allocation6 + $0x70] sm:$0xff]  ;;  %v1518_v33 = vld [vmem:[#allocation6 + $0x198] sm:$0xff] }
 0x197   : > { %1627 = vmatpush.msra.mxu1 %v1517_v34  ;;  %v1513_v44 = vld [vmem:[#allocation6 + $0x170] sm:$0xff]  ;;  %v1554_v34 = vld [vmem:[#allocation6 + $0x2b8] sm:$0xff] }
 0x198   : > { %1646 = vmatpush.msra.mxu2 %v1551_v36  ;;  %1608 = vmatpush.msra.mxu0 %v1483_v37  ;;  %v1545_v49 = vld [vmem:[#allocation6 + $0x270] sm:$0xff]  ;;  %v1516_v36 = vld [vmem:[#allocation6 + $0x188] sm:$0xff]  ;;  %v1510_v53 = vld [vmem:[#allocation6 + $0x158] sm:$0xff] }
 0x199   : > { %1628 = vmatpush.msra.mxu1 %v1515_v38  ;;  %v1477_v54 = vld [vmem:[#allocation6 + $0x50] sm:$0xff]  ;;  %v1552_v37 = vld [vmem:[#allocation6 + $0x2a8] sm:$0xff]  ;;  %v1482_v38 = vld [vmem:[#allocation6 + $0x78] sm:$0xff] }
 0x19a   : > { %1647 = vmatpush.msra.mxu2 %v1549_v39  ;;  %1609 = vmatpush.msra.mxu0 %v1481_v42  ;;  %v1509_v55 = vld [vmem:[#allocation6 + $0x150] sm:$0xff]  ;;  %v1514_v39 = vld [vmem:[#allocation6 + $0x178] sm:$0xff]  ;;  %v1591_v42 = vld [vmem:[#allocation6 + $0x3e0] sm:$0xff] }
 0x19b   : > { %1629 = vmatpush.msra.mxu1 %v1513_v44  ;;  %v1541_v58 = vld [vmem:[#allocation6 + $0x250] sm:$0xff]  ;;  %v1506_v51 = vld [vmem:[#allocation6 + $0x138] sm:$0xff] }
 0x19c   : > { %1648 = vmatpush.msra.mxu2 %v1547_v46  ;;  %1610 = vmatpush.msra.mxu0 %v1479_v47  ;;  %v1473_v61 = vld [vmem:[#allocation6 + $0x30] sm:$0xff]  ;;  %v1512_v46 = vld [vmem:[#allocation6 + $0x168] sm:$0xff]  ;;  %v1160_v47 = vpop.f32.mrf.mxu0 }
 0x19d   : > { %1630 = vmatpush.msra.mxu1 %v1511_v48  ;;  %v1505_v62 = vld [vmem:[#allocation6 + $0x130] sm:$0xff]  ;;  %v1548_v48 = vld [vmem:[#allocation6 + $0x288] sm:$0xff] }
 0x19e   : > { %1649 = vmatpush.msra.mxu2 %v1545_v49  ;;  %1611 = vmatpush.msra.mxu0 %v1477_v54  ;;  %v1537_v4 = vld [vmem:[#allocation6 + $0x230] sm:$0xff]  ;;  %v1587_v49 = vld [vmem:[#allocation6 + $0x3c0] sm:$0xff]  ;;  %v1161_v54 = vadd.f32 %v1160_v47, %v817_v40  ;;  %v1582_v40 = vld [vmem:[#allocation6 + $0x398] sm:$0xff] }
 0x19f   : > { %1631 = vmatpush.msra.mxu1 %v1509_v55  ;;  %v1469_v60 = vld [vmem:[#allocation6 + $0x10] sm:$0xff]  ;;  %v1546_v55 = vld [vmem:[#allocation6 + $0x278] sm:$0xff] }
 0x1a0   : > { %1650 = vmatpush.msra.mxu2 %v1543_v56  ;;  %1612 = vmatpush.msra.mxu0 %v1475_v2  ;;  %v1501_v8 = vld [vmem:[#allocation6 + $0x110] sm:$0xff]  ;;  %v1476_v56 = vld [vmem:[#allocation6 + $0x48] sm:$0xff]  ;;  %v1570_v47 = vld [vmem:[#allocation6 + $0x338] sm:$0xff] }
 0x1a1   : > { %1632 = vmatpush.msra.mxu1 %v1507_v57  ;;  %v1533_v15 = vld [vmem:[#allocation6 + $0x210] sm:$0xff]  ;;  %v1508_v2 = vld [vmem:[#allocation6 + $0x148] sm:$0xff]  ;;  %v1180_v57 = vpop.f32.mrf.mxu1 }
 0x1a2   : > { %1651 = vmatpush.msra.mxu2 %v1541_v58  ;;  %1613 = vmatpush.msra.mxu0 %v1473_v61  ;;  %v1593_v30 = vld [vmem:[#allocation6 + $0x3f0] sm:$0xff]  ;;  %v1181_v58 = vadd.f32 %v1180_v57, %v1161_v54  ;;  %v1583_v61 = vld [vmem:[#allocation6 + $0x3a0] sm:$0xff] }
 0x1a3   : > { %1633 = vmatpush.msra.mxu1 %v1505_v62  ;;  %1661 = vmatpush.msra.mxu3 %v1593_v30  ;;  %v1589_v44 = vld [vmem:[#allocation6 + $0x3d0] sm:$0xff]  ;;  %v1474_v62 = vld [vmem:[#allocation6 + $0x38] sm:$0xff]  ;;  %v1532_v30 = vld [vmem:[#allocation6 + $0x208] sm:$0xff] }
 0x1a4   : > { %1652 = vmatpush.msra.mxu2 %v1539_v7  ;;  %1614 = vmatpush.msra.mxu0 %v1471_v63  ;;  %v1585_v43 = vld [vmem:[#allocation6 + $0x3b0] sm:$0xff]  ;;  %v1201_v7 = vadd.f32 %v1200_v59, %v1181_v58  ;;  %v1542_v63 = vld [vmem:[#allocation6 + $0x258] sm:$0xff] }
 0x1a5   : > { %1634 = vmatpush.msra.mxu1 %v1503_v3  ;;  %1662 = vmatpush.msra.mxu3 %v1591_v42  ;;  %v1581_v3 = vld [vmem:[#allocation6 + $0x390] sm:$0xff]  ;;  %v1578_v42 = vld [vmem:[#allocation6 + $0x378] sm:$0xff] }
 0x1a6   : > { %1653 = vmatpush.msra.mxu2 %v1537_v4  ;;  %1615 = vmatpush.msra.mxu0 %v1469_v60  ;;  %v1472_v4 = vld [vmem:[#allocation6 + $0x28] sm:$0xff]  ;;  %v1565_v6 = vld [vmem:[#allocation6 + $0x310] sm:$0xff] }
 0x1a7   : > { %1635 = vmatpush.msra.mxu1 %v1501_v8  ;;  %1663 = vmatpush.msra.mxu3 %v1589_v44  ;;  %v1504_v60 = vld [vmem:[#allocation6 + $0x128] sm:$0xff]  ;;  %v1220_v8 = vpop.f32.mrf.mxu3 }
 0x1a8   : > { %1654 = vmatpush.msra.mxu2 %v1535_v1  ;;  %1616 = vmatpush.msra.mxu0 %v1467_v10  ;;  %v1221_v1 = vadd.f32 %v1220_v8, %v1201_v7  ;;  %v1540_v10 = vld [vmem:[#allocation6 + $0x248] sm:$0xff]  ;;  %v1595_v8 = vld [vmem:[#allocation7] sm:$0x3] }
 0x1a9   : > { %1636 = vmatpush.msra.mxu1 %v1499_v11  ;;  %1617 = vmatmul.f32.vlgmr.msra.gmra.mxu0 %v1463_v12  ;;  %v1579_v11 = vld [vmem:[#allocation6 + $0x380] sm:$0xff]  ;;  %v1576_v44 = vld [vmem:[#allocation6 + $0x368] sm:$0xff] }
 0x1aa   : > { %1637 = vmatmul.f32.vlgmr.msra.gmra.mxu1 %v1464_v13  ;;  %1681 = vmatpush.msrb.mxu0 %v1498_v14  ;;  %v1470_v14 = vld [vmem:[#allocation6 + $0x18] sm:$0xff] }
 0x1ab   : > { %1701 = vmatpush.msrb.mxu1 %v1530_v9  ;;  %1655 = vmatpush.msra.mxu2 %v1533_v15  ;;  %v1502_v9 = vld [vmem:[#allocation6 + $0x118] sm:$0xff] }
 0x1ac   : > { %1682 = vmatpush.msrb.mxu0 %v1496_v16  ;;  %1664 = vmatpush.msra.mxu3 %v1587_v49  ;;  %v1538_v16 = vld [vmem:[#allocation6 + $0x238] sm:$0xff] }
 0x1ad   : > { %1702 = vmatpush.msrb.mxu1 %v1528_v17  ;;  %1656 = vmatpush.msra.mxu2 %v1531_v18  ;;  %v1577_v17 = vld [vmem:[#allocation6 + $0x370] sm:$0xff]  ;;  %v1468_v18 = vld [vmem:[#allocation6 + $0x8] sm:$0xff]  ;;  %v1566_v49 = vld [vmem:[#allocation6 + $0x318] sm:$0xff] }
 0x1ae   : > { %1683 = vmatpush.msrb.mxu0 %v1494_v20  ;;  %1665 = vmatpush.msra.mxu3 %v1585_v43  ;;  %v1500_v20 = vld [vmem:[#allocation6 + $0x108] sm:$0xff] }
 0x1af   : > { %1703 = vmatpush.msrb.mxu1 %v1526_v19  ;;  %1721 = vmatpush.msrb.mxu2 %v1562_v21 }
 0x1b0   : > { %1684 = vmatpush.msrb.mxu0 %v1492_v22  ;;  %1666 = vmatpush.msra.mxu3 %v1583_v61  ;;  %v1536_v22 = vld [vmem:[#allocation6 + $0x228] sm:$0xff] }
 0x1b1   : > { %1704 = vmatpush.msrb.mxu1 %v1524_v24  ;;  %1722 = vmatpush.msrb.mxu2 %v1560_v23  ;;  %v1575_v24 = vld [vmem:[#allocation6 + $0x360] sm:$0xff] }
 0x1b2   : > { %1685 = vmatpush.msrb.mxu0 %v1490_v26  ;;  %1667 = vmatpush.msra.mxu3 %v1581_v3 }
 0x1b3   : > { %1705 = vmatpush.msrb.mxu1 %v1522_v25  ;;  %1723 = vmatpush.msrb.mxu2 %v1558_v27  ;;  %v1534_v25 = vld [vmem:[#allocation6 + $0x218] sm:$0xff]  ;;  %v1573_v27 = vld [vmem:[#allocation6 + $0x350] sm:$0xff] }
 0x1b4   : > { %1686 = vmatpush.msrb.mxu0 %v1488_v28  ;;  %1668 = vmatpush.msra.mxu3 %v1579_v11  ;;  %v1597_v11 = vperm.slane %v1595_v8, 0 }
 0x1b5   : > { %1706 = vmatpush.msrb.mxu1 %v1520_v29  ;;  %1724 = vmatpush.msrb.mxu2 %v1556_v31  ;;  %v1571_v31 = vld [vmem:[#allocation6 + $0x340] sm:$0xff] }
 0x1b6   : > { %1687 = vmatpush.msrb.mxu0 %v1486_v32  ;;  %1669 = vmatpush.msra.mxu3 %v1577_v17 }
 0x1b7   : > { %1707 = vmatpush.msrb.mxu1 %v1518_v33  ;;  %1725 = vmatpush.msrb.mxu2 %v1554_v34  ;;  %v1569_v33 = vld [vmem:[#allocation6 + $0x330] sm:$0xff] }
 0x1b8   : > { %1688 = vmatpush.msrb.mxu0 %v1484_v35  ;;  %1670 = vmatpush.msra.mxu3 %v1575_v24  ;;  %v1592_v35 = vld [vmem:[#allocation6 + $0x3e8] sm:$0xff] }
 0x1b9   : > { %1708 = vmatpush.msrb.mxu1 %v1516_v36  ;;  %1726 = vmatpush.msrb.mxu2 %v1552_v37  ;;  %v1590_v36 = vld [vmem:[#allocation6 + $0x3d8] sm:$0xff]  ;;  %v1588_v37 = vld [vmem:[#allocation6 + $0x3c8] sm:$0xff] }
 0x1ba   : > { %1689 = vmatpush.msrb.mxu0 %v1482_v38  ;;  %1671 = vmatpush.msra.mxu3 %v1573_v27  ;;  %v1586_v38 = vld [vmem:[#allocation6 + $0x3b8] sm:$0xff]  ;;  %v1769_v27 = vlaneseq }
 0x1bb   : > { %1709 = vmatpush.msrb.mxu1 %v1514_v39  ;;  %1727 = vmatpush.msrb.mxu2 %v1550_v41  ;;  %v1240_v15 = vpop.f32.mrf.mxu0  ;;  %v1584_v39 = vld [vmem:[#allocation6 + $0x3a8] sm:$0xff] }
 0x1bc   : > { %1690 = vmatpush.msrb.mxu0 %v1480_v45  ;;  %v1241_v19 = vadd.f32 %v1240_v15, %v1221_v1  ;;  %1672 = vmatpush.msra.mxu3 %v1571_v31  ;;  %v1580_v41 = vld [vmem:[#allocation6 + $0x388] sm:$0xff]  ;;  %v1574_v45 = vld [vmem:[#allocation6 + $0x358] sm:$0xff]  ;;  %vm1771_vm1 = vcmp.lt.s32.totalorder %v1769_v27, 256 }
 0x1bd   : > { %1710 = vmatpush.msrb.mxu1 %v1512_v46  ;;  %1728 = vmatpush.msrb.mxu2 %v1548_v48  ;;  %v1572_v46 = vld [vmem:[#allocation6 + $0x348] sm:$0xff] }
 0x1be   : > { %1691 = vmatpush.msrb.mxu0 %v1478_v52  ;;  %1673 = vmatpush.msra.mxu3 %v1569_v33  ;;  %v1568_v48 = vld [vmem:[#allocation6 + $0x328] sm:$0xff] }
 0x1bf   : > { %1711 = vmatpush.msrb.mxu1 %v1510_v53  ;;  %1729 = vmatpush.msrb.mxu2 %v1546_v55  ;;  %v1564_v52 = vld [vmem:[#allocation6 + $0x308] sm:$0xff]  ;;  %v818_v53 = vperm.slane %v2244_v50, 3 }
 0x1c0   : > { %1692 = vmatpush.msrb.mxu0 %v1476_v56  ;;  %1674 = vmatpush.msra.mxu3 %v1567_v5 }
 0x1c1   : > { %1712 = vmatpush.msrb.mxu1 %v1508_v2  ;;  %1730 = vmatpush.msrb.mxu2 %v1544_v0 }
 0x1c2   : > { %1693 = vmatpush.msrb.mxu0 %v1474_v62  ;;  %v1260_v21 = vpop.f32.mrf.mxu1  ;;  %1675 = vmatpush.msra.mxu3 %v1565_v6 }
 0x1c3   : > { %1713 = vmatpush.msrb.mxu1 %v1506_v51  ;;  %1731 = vmatpush.msrb.mxu2 %v1542_v63  ;;  %v1261_v23 = vadd.f32 %v1260_v21, %v1241_v19  ;;  %v1280_v26 = vpop.f32.mrf.mxu2 }
 0x1c4   : > { %1694 = vmatpush.msrb.mxu0 %v1472_v4 }
 0x1c5   : > { %1714 = vmatpush.msrb.mxu1 %v1504_v60  ;;  %1732 = vmatpush.msrb.mxu2 %v1540_v10  ;;  %v1281_v28 = vadd.f32 %v1280_v26, %v1261_v23 }
 0x1c6   : > { %1695 = vmatpush.msrb.mxu0 %v1470_v14  ;;  %v1300_v29 = vpop.f32.mrf.mxu3  ;;  %v1598_v14 = vperm.slane %v1595_v8, 1 }
 0x1c7   : > { %1715 = vmatpush.msrb.mxu1 %v1502_v9  ;;  %1733 = vmatpush.msrb.mxu2 %v1538_v16  ;;  %v1301_v32 = vadd.f32 %v1300_v29, %v1281_v28 }
 0x1c8   : > { %1696 = vmatpush.msrb.mxu0 %v1468_v18 }
 0x1c9   : > { %1716 = vmatpush.msrb.mxu1 %v1500_v20  ;;  %1697 = vmatmul.f32.vlgmr.msrb.gmra.mxu0 %v1463_v12  ;;  %v1465_v34 = vmax.f32 %v1301_v32, 0.0  ;;  %v1563_v12 = vld [vmem:[#allocation6 + $0x300] sm:$0xff] }
 0x1ca   : > { %1717 = vmatmul.f32.vlgmr.msrb.gmra.mxu1 %v1464_v13  ;;  %1734 = vmatpush.msrb.mxu2 %v1536_v22  ;;  %v1594_v13 = vld [vmem:[#allocation6 + $0x3f8] sm:$0xff] }
 0x1cb   : > { %1657 = vmatmul.f32.vlgmr.msra.gmra.mxu2 %v1465_v34  ;;  %1676 = vmatpush.msra.mxu3 %v1563_v12 }
 0x1cc   : > { %1735 = vmatpush.msrb.mxu2 %v1534_v25 }
 0x1cd   : > { %1741 = vmatpush.msrb.mxu3 %v1594_v13 }
 0x1ce   : > { %1736 = vmatpush.msrb.mxu2 %v1532_v30 }
 0x1cf   : > { %1742 = vmatpush.msrb.mxu3 %v1592_v35 }
 0x1d1   : > { %1743 = vmatpush.msrb.mxu3 %v1590_v36 }
 0x1d3   : > { %1737 = vmatmul.f32.vlgmr.msrb.gmra.mxu2 %v1465_v34  ;;  %1744 = vmatpush.msrb.mxu3 %v1588_v37 }
 0x1d5   : > { %1745 = vmatpush.msrb.mxu3 %v1586_v38 }
 0x1d7   : > { %1746 = vmatpush.msrb.mxu3 %v1584_v39 }
 0x1d9   : > { %1747 = vmatpush.msrb.mxu3 %v1582_v40 }
 0x1db   : > { %1748 = vmatpush.msrb.mxu3 %v1580_v41 }
 0x1dd   : > { %1749 = vmatpush.msrb.mxu3 %v1578_v42 }
 0x1df   : > { %1750 = vmatpush.msrb.mxu3 %v1576_v44 }
 0x1e1   : > { %1751 = vmatpush.msrb.mxu3 %v1574_v45 }
 0x1e3   : > { %1752 = vmatpush.msrb.mxu3 %v1572_v46 }
 0x1e5   : > { %1753 = vmatpush.msrb.mxu3 %v1570_v47 }
 0x1e7   : > { %1754 = vmatpush.msrb.mxu3 %v1568_v48 }
 0x1e9   : > { %1755 = vmatpush.msrb.mxu3 %v1566_v49 }
 0x1eb   : > { %1756 = vmatpush.msrb.mxu3 %v1564_v52 }
 0x1f8   : > { %v1320_v54 = vpop.f32.mrf.mxu0 }
 0x1f9   : > { %v1321_v55 = vadd.f32 %v1320_v54, %v818_v53  ;;  %v1340_v43 = vpop.f32.mrf.mxu1 }
 0x1fb   : > { %v1341_v56 = vadd.f32 %v1340_v43, %v1321_v55 }
 0x1fc   : > { %v1360_v2 = vpop.f32.mrf.mxu2 }
 0x1fd   : > { %v1361_v57 = vadd.f32 %v1360_v2, %v1341_v56  ;;  %v1380_v58 = vpop.f32.mrf.mxu3 }
 0x1ff   : > { %v1381_v59 = vadd.f32 %v1380_v58, %v1361_v57 }
 0x204   : > { %v1400_v0 = vpop.f32.mrf.mxu0 }
 0x205   : > { %v1401_v61 = vadd.f32 %v1400_v0, %v1381_v59  ;;  %v1420_v62 = vpop.f32.mrf.mxu1 }
 0x207   : > { %v1421_v51 = vadd.f32 %v1420_v62, %v1401_v61 }
 0x20c   : > { %v1440_v7 = vpop.f32.mrf.mxu2 }
 0x20d   : > { %v1441_v63 = vadd.f32 %v1440_v7, %v1421_v51 }
 0x210   : > { %v1460_v3 = vpop.f32.mrf.mxu3 }
 0x211   : > { %v1461_v4 = vadd.f32 %v1460_v3, %v1441_v63 }
 0x213   : > { %v1466_v60 = vmax.f32 %v1461_v4, 0.0 }
 0x215   : > { %1677 = vmatmul.f32.vlgmr.msra.gmra.mxu3 %v1466_v60 }
 0x21d   : > { %1757 = vmatmul.f32.vlgmr.msrb.gmra.mxu3 %v1466_v60 }
 0x226   : > { %v1618_v50 = vpop.f32.mrf.mxu0 }
 0x227   : > { %v1638_v10 = vpop.f32.mrf.mxu1  ;;  %v1619_v16 = vadd.f32 %v1618_v50, %v1597_v11 }
 0x229   : > { %v1639_v19 = vadd.f32 %v1638_v10, %v1619_v16 }
 0x246   : > { %v1698_v9 = vpop.f32.mrf.mxu0 }
 0x247   : > { %v1699_v17 = vadd.f32 %v1698_v9, %v1598_v14  ;;  %v1718_v18 = vpop.f32.mrf.mxu1 }
 0x249   : > { %v1719_v21 = vadd.f32 %v1718_v18, %v1699_v17 }
 0x24e   : > { %v1658_v1 = vpop.f32.mrf.mxu2 }
 0x24f   : > { %v1659_v22 = vadd.f32 %v1658_v1, %v1639_v19 }
 0x256   : > { %v1738_v20 = vpop.f32.mrf.mxu2 }
 0x257   : > { %v1739_v24 = vadd.f32 %v1738_v20, %v1719_v21 }
 0x298   : > { %v1678_v15 = vpop.f32.mrf.mxu3 }
 0x299   : > { %v1679_v26 = vadd.f32 %v1678_v15, %v1659_v22 }
 0x29b   : > { %v1761_v29 = vmax.f32 %v1679_v26, 0.0 }
 0x2a0   : > { %v1758_v23 = vpop.f32.mrf.mxu3 }
 0x2a1   : > { %v1759_v25 = vadd.f32 %v1758_v23, %v1739_v24 }
 0x2a3   : > { %v1762_v28 = vmax.f32 %v1759_v25, 0.0 }
 0x2a5   : > { %v1765_v30 = vrot.slane %v1762_v28, 7 }
 0x2a7   : > { %v1767_v31 = vsel %vm1766_vm0, %v1761_v29, %v1765_v30 }
 0x2a8   : > { %1773 = vst.msk [vmem:[%s282_s30] sm:$0x3] %vm1771_vm1, %v1767_v31 }
 0x2a9 PF: > { %s18_s18 = sadd.s32 1, %s2076_s18  }
 0x2aa   : > { %p15_p7 = scmp.ge.s32.totalorder %s18_s18, 4  }
 0x2ac   :  { %17 = sbr.rel (!%p15_p7) target bundleno = 3 (0x3), region = 87 }
 0x2b1   :  { %1793 = vsyncpa [#allocation3], 1 }
 0x2b2   :  { %1795 = vsyncpa [#allocation3 + $0x1], 1 }
 0x2b3   :  { %1796 = vsyncpa [#allocation5], 1 }
 0x2b4   :  { %1797 = vsyncpa [#allocation8], 1 }

</bundles_post_ra>
